<compile_context>
chip_gen: v7x
topology: tpu7x:2x2x1
jax: 0.10.0
libtpu: 0.0.40
codegen_flags: <defaults>
</compile_context>

<pallas_src>
import jax
import jax.numpy as jnp
from jax.experimental import pallas as pl
from jax.experimental.pallas import tpu as pltpu


def mlp_kernel(x_ref, w1_ref, b1_ref, w2_ref, b2_ref, w3_ref, b3_ref, o_ref):
    # x_ref: (tb, K) bf16; w*: bf16 (in, out); b*: (1, out) f32; o_ref: (tb, 128) f32.
    h1 = jnp.dot(x_ref[...], w1_ref[...],
                 preferred_element_type=jnp.float32) + b1_ref[...]
    h1 = jnp.maximum(h1, 0.0).astype(jnp.bfloat16)
    h2 = jnp.dot(h1, w2_ref[...],
                 preferred_element_type=jnp.float32) + b2_ref[...]
    h2 = jnp.maximum(h2, 0.0).astype(jnp.bfloat16)
    h3 = jnp.dot(h2, w3_ref[...],
                 preferred_element_type=jnp.float32) + b3_ref[...]
    # The PyTorch Sequential ends with nn.ReLU(), so the final ReLU is intentional.
    o_ref[...] = jnp.maximum(h3, 0.0).astype(o_ref.dtype)


def _round_up(x, m):
    return ((x + m - 1) // m) * m


def neural_network_forward(x, params, *, tb=None):
    """Pallas implementation of NeuralNetwork.forward.

    x: (B, C, H, W) float32 (NCHW). Returns (B, 10) float32.
    """
    w1, b1, w2, b2, w3, b3 = params          # weights stored as (in, out), f32
    B = x.shape[0]
    x_flat = x.reshape(B, -1)                 # nn.Flatten()
    D_in = x_flat.shape[1]                    # 784
    H = w1.shape[1]                           # 512
    D_out = w3.shape[1]                       # 10

    # --- padded sizes: lane-dense contraction (896 = 7*128) and output (128) dims ---
    K = _round_up(D_in, 128)                  # 896
    N_out = _round_up(max(D_out, 128), 128)   # 128

    # --- batch tile: MXU-filling for large B, whole (rounded) batch for small B.
    # Cap at 256 so v5e's 16 MiB default scoped VMEM is never an issue, and large B
    # gives a >=2-step grid so both v7x TensorCores get work via "parallel". ---
    if tb is None:
        tb = min(256, _round_up(B, 8))
    tb = max(8, _round_up(min(tb, 256), 8))
    grid_b = pl.cdiv(B, tb)
    B_pad = grid_b * tb

    # --- one-time wrapper-side prep: pad + cast weights to bf16 (biases stay f32) ---
    x_p = jnp.pad(x_flat, ((0, B_pad - B), (0, K - D_in))).astype(jnp.bfloat16)
    w1_p = jnp.pad(w1, ((0, K - D_in), (0, 0))).astype(jnp.bfloat16)
    w2_p = w2.astype(jnp.bfloat16)
    w3_p = jnp.pad(w3, ((0, 0), (0, N_out - D_out))).astype(jnp.bfloat16)
    b1_p = b1.astype(jnp.float32)
    b2_p = b2.astype(jnp.float32)
    b3_p = jnp.pad(b3, ((0, 0), (0, N_out - D_out))).astype(jnp.float32)

    full = lambda i: (0, 0)                   # weights/biases resident across grid
    resident = dict(pipeline_mode=pl.Buffered(1))  # constant blocks: single-buffer

    out = pl.pallas_call(
        mlp_kernel,
        out_shape=jax.ShapeDtypeStruct((B_pad, N_out), jnp.float32),
        grid_spec=pltpu.PrefetchScalarGridSpec(
            num_scalar_prefetch=0,
            grid=(grid_b,),
            in_specs=[
                pl.BlockSpec((tb, K), lambda i: (i, 0)),
                pl.BlockSpec((K, H), full, **resident),
                pl.BlockSpec((1, H), full, **resident),
                pl.BlockSpec((H, H), full, **resident),
                pl.BlockSpec((1, H), full, **resident),
                pl.BlockSpec((H, N_out), full, **resident),
                pl.BlockSpec((1, N_out), full, **resident),
            ],
            out_specs=pl.BlockSpec((tb, N_out), lambda i: (i, 0)),
        ),
        compiler_params=pltpu.CompilerParams(
            dimension_semantics=("parallel",),
            vmem_limit_bytes=64 << 20,
        ),
    )(x_p, w1_p, b1_p, w2_p, b2_p, w3_p, b3_p)

    return out[:B, :D_out]


def init_params(key):
    """Deterministic PyTorch-style (uniform +-1/sqrt(fan_in)) init.

    Weights stored transposed, i.e. (in_features, out_features), so the kernel
    computes x @ W + b exactly like nn.Linear's x @ W_pt.T + b.
    """
    dims = [(28 * 28, 512), (512, 512), (512, 10)]
    keys = jax.random.split(key, 2 * len(dims))
    params = []
    for idx, (fan_in, fan_out) in enumerate(dims):
        bound = 1.0 / jnp.sqrt(jnp.float32(fan_in))
        w = jax.random.uniform(keys[2 * idx], (fan_in, fan_out), jnp.float32,
                               minval=-bound, maxval=bound)
        b = jax.random.uniform(keys[2 * idx + 1], (1, fan_out), jnp.float32,
                               minval=-bound, maxval=bound)
        params += [w, b]
    return tuple(params)


def reference_forward(x, params):
    """Plain-JAX reference with the same bf16-weight / f32-accum numerics."""
    w1, b1, w2, b2, w3, b3 = params
    h = x.reshape(x.shape[0], -1).astype(jnp.bfloat16)
    h = jnp.dot(h, w1.astype(jnp.bfloat16), preferred_element_type=jnp.float32) + b1
    h = jnp.maximum(h, 0.0).astype(jnp.bfloat16)
    h = jnp.dot(h, w2.astype(jnp.bfloat16), preferred_element_type=jnp.float32) + b2
    h = jnp.maximum(h, 0.0).astype(jnp.bfloat16)
    h = jnp.dot(h, w3.astype(jnp.bfloat16), preferred_element_type=jnp.float32) + b3
    return jnp.maximum(h, 0.0)


if __name__ == "__main__":
    key = jax.random.PRNGKey(0)
    pkey, xkey = jax.random.split(key)
    params = init_params(pkey)

    # MNIST-like NCHW input: batch=8, 1 channel, 28x28 spatial.
    x = jax.random.normal(xkey, (8, 1, 28, 28), dtype=jnp.float32)

    out = neural_network_forward(x, params)
    out = jax.block_until_ready(out)

    ref = reference_forward(x, params)
    assert out.shape == (8, 10)
    assert jnp.allclose(out, ref, atol=1e-2, rtol=1e-2)
    print("KERNEL_OK")
</pallas_src>

<mosaic_0001>
module attributes {stable_mosaic.version = 11 : i64} {
  func.func @mlp_kernel(%arg0: i32, %arg1: memref<8x896xbf16, #tpu.memory_space<vmem>>, %arg2: memref<896x512xbf16, #tpu.memory_space<vmem>>, %arg3: memref<1x512xf32, #tpu.memory_space<vmem>>, %arg4: memref<512x512xbf16, #tpu.memory_space<vmem>>, %arg5: memref<1x512xf32, #tpu.memory_space<vmem>>, %arg6: memref<512x128xbf16, #tpu.memory_space<vmem>>, %arg7: memref<1x128xf32, #tpu.memory_space<vmem>>, %arg8: memref<8x128xf32, #tpu.memory_space<vmem>>) attributes {dimension_semantics = [#tpu.dimension_semantics<parallel>], iteration_bounds = array<i64: 1>, scalar_prefetch = 0 : i64, scratch_operands = 0 : i64, tpu.core_type = #tpu.core_type<tc>, window_params = [{transform_indices = @transform_0, window_bounds = array<i64: 8, 896>}, {pipeline_mode = #tpu.pipeline_mode<synchronous>, transform_indices = @transform_1, window_bounds = array<i64: 896, 512>}, {pipeline_mode = #tpu.pipeline_mode<synchronous>, transform_indices = @transform_2, window_bounds = array<i64: 1, 512>}, {pipeline_mode = #tpu.pipeline_mode<synchronous>, transform_indices = @transform_3, window_bounds = array<i64: 512, 512>}, {pipeline_mode = #tpu.pipeline_mode<synchronous>, transform_indices = @transform_4, window_bounds = array<i64: 1, 512>}, {pipeline_mode = #tpu.pipeline_mode<synchronous>, transform_indices = @transform_5, window_bounds = array<i64: 512, 128>}, {pipeline_mode = #tpu.pipeline_mode<synchronous>, transform_indices = @transform_6, window_bounds = array<i64: 1, 128>}, {transform_indices = @transform_7, window_bounds = array<i64: 8, 128>}]} {
    %c0 = arith.constant 0 : index
    %c0_0 = arith.constant 0 : index
    %0 = vector.load %arg1[%c0, %c0_0] : memref<8x896xbf16, #tpu.memory_space<vmem>>, vector<8x896xbf16>
    %c0_1 = arith.constant 0 : index
    %c0_2 = arith.constant 0 : index
    %1 = vector.load %arg2[%c0_1, %c0_2] : memref<896x512xbf16, #tpu.memory_space<vmem>>, vector<896x512xbf16>
    %cst = arith.constant dense<0.000000e+00> : vector<8x512xf32>
    %2 = tpu.matmul %0, %1, %cst {dimension_numbers = #tpu.dot_dimension_numbers<[1], [0], [0], [1], [0, 0, 1, 1], [], []>} : vector<8x896xbf16>, vector<896x512xbf16>, vector<8x512xf32> -> vector<8x512xf32>
    %c0_3 = arith.constant 0 : index
    %c0_4 = arith.constant 0 : index
    %3 = vector.load %arg3[%c0_3, %c0_4] : memref<1x512xf32, #tpu.memory_space<vmem>>, vector<1x512xf32>
    %4 = vector.broadcast %3 : vector<1x512xf32> to vector<8x512xf32>
    %5 = arith.addf %2, %4 : vector<8x512xf32>
    %cst_5 = arith.constant 0.000000e+00 : f32
    %6 = vector.broadcast %cst_5 : f32 to vector<8x512xf32>
    %7 = arith.maximumf %5, %6 : vector<8x512xf32>
    %8 = arith.truncf %7 : vector<8x512xf32> to vector<8x512xbf16>
    %c0_6 = arith.constant 0 : index
    %c0_7 = arith.constant 0 : index
    %9 = vector.load %arg4[%c0_6, %c0_7] : memref<512x512xbf16, #tpu.memory_space<vmem>>, vector<512x512xbf16>
    %cst_8 = arith.constant dense<0.000000e+00> : vector<8x512xf32>
    %10 = tpu.matmul %8, %9, %cst_8 {dimension_numbers = #tpu.dot_dimension_numbers<[1], [0], [0], [1], [0, 0, 1, 1], [], []>} : vector<8x512xbf16>, vector<512x512xbf16>, vector<8x512xf32> -> vector<8x512xf32>
    %c0_9 = arith.constant 0 : index
    %c0_10 = arith.constant 0 : index
    %11 = vector.load %arg5[%c0_9, %c0_10] : memref<1x512xf32, #tpu.memory_space<vmem>>, vector<1x512xf32>
    %12 = vector.broadcast %11 : vector<1x512xf32> to vector<8x512xf32>
    %13 = arith.addf %10, %12 : vector<8x512xf32>
    %cst_11 = arith.constant 0.000000e+00 : f32
    %14 = vector.broadcast %cst_11 : f32 to vector<8x512xf32>
    %15 = arith.maximumf %13, %14 : vector<8x512xf32>
    %16 = arith.truncf %15 : vector<8x512xf32> to vector<8x512xbf16>
    %c0_12 = arith.constant 0 : index
    %c0_13 = arith.constant 0 : index
    %17 = vector.load %arg6[%c0_12, %c0_13] : memref<512x128xbf16, #tpu.memory_space<vmem>>, vector<512x128xbf16>
    %cst_14 = arith.constant dense<0.000000e+00> : vector<8x128xf32>
    %18 = tpu.matmul %16, %17, %cst_14 {dimension_numbers = #tpu.dot_dimension_numbers<[1], [0], [0], [1], [0, 0, 1, 1], [], []>} : vector<8x512xbf16>, vector<512x128xbf16>, vector<8x128xf32> -> vector<8x128xf32>
    %c0_15 = arith.constant 0 : index
    %c0_16 = arith.constant 0 : index
    %19 = vector.load %arg7[%c0_15, %c0_16] : memref<1x128xf32, #tpu.memory_space<vmem>>, vector<1x128xf32>
    %20 = vector.broadcast %19 : vector<1x128xf32> to vector<8x128xf32>
    %21 = arith.addf %18, %20 : vector<8x128xf32>
    %cst_17 = arith.constant 0.000000e+00 : f32
    %22 = vector.broadcast %cst_17 : f32 to vector<8x128xf32>
    %23 = arith.maximumf %21, %22 : vector<8x128xf32>
    %c0_18 = arith.constant 0 : index
    %c0_19 = arith.constant 0 : index
    %24 = vector.load %arg8[%c0_18, %c0_19] : memref<8x128xf32, #tpu.memory_space<vmem>>, vector<8x128xf32>
    tpu.vector_store %arg8[%c0_18, %c0_19], %23 {strides = array<i32>} : memref<8x128xf32, #tpu.memory_space<vmem>>, vector<8x128xf32>,
    return
  }
  func.func @transform_0(%arg0: i32) -> (i32, i32) {
    %c0_i32 = arith.constant 0 : i32
    %c0_i32_0 = arith.constant 0 : i32
    return %arg0, %c0_i32 : i32, i32
  }
  func.func @transform_1(%arg0: i32) -> (i32, i32) {
    %c0_i32 = arith.constant 0 : i32
    %c0_i32_0 = arith.constant 0 : i32
    %c0_i32_1 = arith.constant 0 : i32
    return %c0_i32, %c0_i32_0 : i32, i32
  }
  func.func @transform_2(%arg0: i32) -> (i32, i32) {
    %c0_i32 = arith.constant 0 : i32
    %c0_i32_0 = arith.constant 0 : i32
    %c0_i32_1 = arith.constant 0 : i32
    return %c0_i32, %c0_i32_0 : i32, i32
  }
  func.func @transform_3(%arg0: i32) -> (i32, i32) {
    %c0_i32 = arith.constant 0 : i32
    %c0_i32_0 = arith.constant 0 : i32
    %c0_i32_1 = arith.constant 0 : i32
    return %c0_i32, %c0_i32_0 : i32, i32
  }
  func.func @transform_4(%arg0: i32) -> (i32, i32) {
    %c0_i32 = arith.constant 0 : i32
    %c0_i32_0 = arith.constant 0 : i32
    %c0_i32_1 = arith.constant 0 : i32
    return %c0_i32, %c0_i32_0 : i32, i32
  }
  func.func @transform_5(%arg0: i32) -> (i32, i32) {
    %c0_i32 = arith.constant 0 : i32
    %c0_i32_0 = arith.constant 0 : i32
    %c0_i32_1 = arith.constant 0 : i32
    return %c0_i32, %c0_i32_0 : i32, i32
  }
  func.func @transform_6(%arg0: i32) -> (i32, i32) {
    %c0_i32 = arith.constant 0 : i32
    %c0_i32_0 = arith.constant 0 : i32
    %c0_i32_1 = arith.constant 0 : i32
    return %c0_i32, %c0_i32_0 : i32, i32
  }
  func.func @transform_7(%arg0: i32) -> (i32, i32) {
    %c0_i32 = arith.constant 0 : i32
    %c0_i32_0 = arith.constant 0 : i32
    return %arg0, %c0_i32 : i32, i32
  }
}

</mosaic_0001>

<bundles_post_ra>
// kernel: tpu_custom_call.1
= control target key start
LH: loop header
LB: loop body
LE: loop exit
PB: predicated region body
PF: predicated region fallthrough
CT: control target
= control target key end

     0   :  { %12 = vsyncpa [#allocation3], 0  ;;  %s4605_s0 = inlined_call_operand.hbm [shape: bf16[8,896], index: 0, kind: input, shape index: {}]   ;;  %s4606_s1 = inlined_call_operand.hbm [shape: bf16[896,512], index: 1, kind: input, shape index: {}]   ;;  %s4607_s2 = inlined_call_operand.hbm [shape: f32[1,512], index: 2, kind: input, shape index: {}]   ;;  %s4608_s3 = inlined_call_operand.hbm [shape: bf16[512,512], index: 3, kind: input, shape index: {}]   ;;  %s4609_s4 = inlined_call_operand.hbm [shape: f32[1,512], index: 4, kind: input, shape index: {}]   ;;  %s4610_s5 = inlined_call_operand.hbm [shape: bf16[512,128], index: 5, kind: input, shape index: {}]   ;;  %s4611_s6 = inlined_call_operand.hbm [shape: f32[1,128], index: 6, kind: input, shape index: {}]   ;;  %s4612_s7 = inlined_call_operand.hbm [shape: f32[8,128], index: 7, kind: output, shape index: {}]  }
   0x1   :  { %13 = vsyncpa [#allocation6], 0 }
   0x2   :  { %14 = vsyncpa [#allocation9], 0 }
   0x3   :  { %15 = vsyncpa [#allocation12], 0 }
   0x4   :  { %16 = vsyncpa [#allocation4], 0  ;;  %s4413_s24 = smov [#allocation5]   ;;  %s4227_s28 = scalar_lea.hbm %s4606_s1, 28672 }
   0x5   :  { %s32_s25 = sshll.u32 %s4413_s24, 4  ;;  %p4228_p0 = scmp.ne.s32.totalorder %s4606_s1, %s4227_s28  ;;  %s33_s25 = int_to_ptr.vmem [resolvable:$true] %s32_s25 }
   0x6   :  { %p4231_p1 = scmp.lt.u32.totalorder %s4227_s28, %s4606_s1 }
   0x8   :  { %p4233_p2 = pnand %p4231_p1, %p4228_p0 }
   0xa   :  { %4236 = shalt.err (!%p4233_p2)
}
   0xb   :  { %s4237_s10 = scalar_lea.vmem %s33_s25, 28672  ;;  %p4242_p4 = scmp.lt.s32.totalorder %s33_s25, %s33_s25 }
   0xc   :  { %p4238_p3 = scmp.ne.s32.totalorder %s33_s25, %s4237_s10  ;;  %p4243_p5 = scmp.lt.s32.totalorder %s4237_s10, %s4237_s10 }
   0xe   :  { %p4244_p6 = por %p4243_p5, %p4242_p4 }
  0x10   :  { %p4245_p7 = pnand %p4244_p6, %p4238_p3 }
  0x12   :  { %4248 = shalt.err (!%p4245_p7)
}
  0x13   :  { %s4414_s11 = smov 256   ;;  %s4415_s12 = smov 16  }
  0x14   :  { %38 = dma.hbm_to_vmem [thread:$0]  %s4606_s1, 28672, %s33_s25, [#allocation6], %s4414_s11, %s4414_s11, %s4415_s12  }
  0x15   :  { %s4416_s15 = smov [#allocation8]   ;;  %s4417_s17 = smov [#allocation11]  }
  0x16   :  { %s54_s16 = sshll.u32 %s4416_s15, 4  ;;  %s76_s18 = sshll.u32 %s4417_s17, 4  ;;  %s55_s16 = int_to_ptr.vmem [resolvable:$true] %s54_s16  ;;  %s77_s18 = int_to_ptr.vmem [resolvable:$true] %s76_s18 }
  0x17   :  { %s4249_s21 = scalar_lea.hbm %s4608_s3, 16384 }
  0x18   :  { %p4250_p8 = scmp.ne.s32.totalorder %s4608_s3, %s4249_s21  ;;  %p4253_p9 = scmp.lt.u32.totalorder %s4249_s21, %s4608_s3 }
  0x1a   :  { %p4255_p10 = pnand %p4253_p9, %p4250_p8 }
  0x1c   :  { %4258 = shalt.err (!%p4255_p10)
}
  0x1d   :  { %s4259_s1 = scalar_lea.vmem %s55_s16, 16384  ;;  %p4264_p12 = scmp.lt.s32.totalorder %s55_s16, %s55_s16 }
  0x1e   :  { %p4260_p11 = scmp.ne.s32.totalorder %s55_s16, %s4259_s1  ;;  %p4265_p13 = scmp.lt.s32.totalorder %s4259_s1, %s4259_s1 }
  0x20   :  { %p4266_p0 = por %p4265_p13, %p4264_p12 }
  0x22   :  { %p4267_p1 = pnand %p4266_p0, %p4260_p11 }
  0x24   :  { %4270 = shalt.err (!%p4267_p1)
}
  0x25   :  { %60 = dma.hbm_to_vmem [thread:$0]  %s4608_s3, 16384, %s55_s16, [#allocation9], %s4414_s11, %s4414_s11, %s4415_s12  }
  0x26   :  { %s4271_s30 = scalar_lea.hbm %s4610_s5, 4096 }
  0x27   :  { %p4272_p2 = scmp.ne.s32.totalorder %s4610_s5, %s4271_s30  ;;  %p4275_p3 = scmp.lt.u32.totalorder %s4271_s30, %s4610_s5 }
  0x29   :  { %p4277_p4 = pnand %p4275_p3, %p4272_p2 }
  0x2b   :  { %4280 = shalt.err (!%p4277_p4)
}
  0x2c   :  { %s4281_s14 = scalar_lea.vmem %s77_s18, 4096  ;;  %p4286_p6 = scmp.lt.s32.totalorder %s77_s18, %s77_s18 }
  0x2d   :  { %p4282_p5 = scmp.ne.s32.totalorder %s77_s18, %s4281_s14  ;;  %p4287_p7 = scmp.lt.s32.totalorder %s4281_s14, %s4281_s14 }
  0x2f   :  { %p4288_p8 = por %p4287_p7, %p4286_p6 }
  0x31   :  { %p4289_p9 = pnand %p4288_p8, %p4282_p5 }
  0x33   :  { %4292 = shalt.err (!%p4289_p9)
}
  0x34   :  { %s4418_s3 = smov 64   ;;  %s4419_s11 = smov 4  }
  0x35   :  { %82 = dma.hbm_to_vmem [thread:$0]  %s4610_s5, 4096, %s77_s18, [#allocation12], %s4418_s3, %s4418_s3, %s4419_s11  }
  0x36   :  { %s4420_s16 = smov [#allocation2]   ;;  %s4421_s19 = smov [#allocation7]  }
  0x37   :  { %s23_s17 = sshll.u32 %s4420_s16, 4  ;;  %s45_s20 = sshll.u32 %s4421_s19, 4  ;;  %s24_s17 = int_to_ptr.vmem [resolvable:$true] %s23_s17  ;;  %s46_s20 = int_to_ptr.vmem [resolvable:$true] %s45_s20 }
  0x38   :  { %s4293_s23 = scalar_lea.hbm %s4605_s0, 448 }
  0x39   :  { %p4294_p10 = scmp.ne.s32.totalorder %s4605_s0, %s4293_s23  ;;  %p4297_p11 = scmp.lt.u32.totalorder %s4293_s23, %s4605_s0 }
  0x3b   :  { %p4299_p12 = pnand %p4297_p11, %p4294_p10 }
  0x3d   :  { %4302 = shalt.err (!%p4299_p12)
}
  0x3e   :  { %s4303_s5 = scalar_lea.vmem %s24_s17, 448  ;;  %p4308_p0 = scmp.lt.s32.totalorder %s24_s17, %s24_s17 }
  0x3f   :  { %p4304_p13 = scmp.ne.s32.totalorder %s24_s17, %s4303_s5  ;;  %p4309_p1 = scmp.lt.s32.totalorder %s4303_s5, %s4303_s5 }
  0x41   :  { %p4310_p2 = por %p4309_p1, %p4308_p0 }
  0x43   :  { %p4311_p3 = pnand %p4310_p2, %p4304_p13 }
  0x45   :  { %4314 = shalt.err (!%p4311_p3)
}
  0x46   :  { %26 = dma.hbm_to_vmem [thread:$0]  %s4605_s0, 448, %s24_s17, [#allocation3]  }
  0x47   :  { %s4315_s30 = scalar_lea.hbm %s4607_s2, 64 }
  0x48   :  { %p4316_p4 = scmp.ne.s32.totalorder %s4607_s2, %s4315_s30  ;;  %p4319_p5 = scmp.lt.u32.totalorder %s4315_s30, %s4607_s2 }
  0x4a   :  { %p4321_p6 = pnand %p4319_p5, %p4316_p4 }
  0x4c   :  { %4324 = shalt.err (!%p4321_p6)
}
  0x4d   :  { %s4325_s14 = scalar_lea.vmem %s46_s20, 64  ;;  %p4330_p8 = scmp.lt.s32.totalorder %s46_s20, %s46_s20 }
  0x4e   :  { %p4326_p7 = scmp.ne.s32.totalorder %s46_s20, %s4325_s14  ;;  %p4331_p9 = scmp.lt.s32.totalorder %s4325_s14, %s4325_s14 }
  0x50   :  { %p4332_p10 = por %p4331_p9, %p4330_p8 }
  0x52   :  { %p4333_p11 = pnand %p4332_p10, %p4326_p7 }
  0x54   :  { %4336 = shalt.err (!%p4333_p11)
}
  0x55   :  { %48 = dma.hbm_to_vmem [thread:$0]  %s4607_s2, 64, %s46_s20, [#allocation6]  }
  0x56   :  { %s4422_s11 = smov [#allocation10]   ;;  %s4423_s15 = smov [#allocation13]  }
  0x57   :  { %s67_s12 = sshll.u32 %s4422_s11, 4  ;;  %s89_s16 = sshll.u32 %s4423_s15, 4  ;;  %s68_s12 = int_to_ptr.vmem [resolvable:$true] %s67_s12  ;;  %s90_s16 = int_to_ptr.vmem [resolvable:$true] %s89_s16 }
  0x58   :  { %s4337_s21 = scalar_lea.hbm %s4609_s4, 64 }
  0x59   :  { %p4338_p12 = scmp.ne.s32.totalorder %s4609_s4, %s4337_s21  ;;  %p4341_p13 = scmp.lt.u32.totalorder %s4337_s21, %s4609_s4 }
  0x5b   :  { %p4343_p0 = pnand %p4341_p13, %p4338_p12 }
  0x5d   :  { %4346 = shalt.err (!%p4343_p0)
}
  0x5e   :  { %s4347_s2 = scalar_lea.vmem %s68_s12, 64  ;;  %p4352_p2 = scmp.lt.s32.totalorder %s68_s12, %s68_s12 }
  0x5f   :  { %p4348_p1 = scmp.ne.s32.totalorder %s68_s12, %s4347_s2  ;;  %p4353_p3 = scmp.lt.s32.totalorder %s4347_s2, %s4347_s2 }
  0x61   :  { %p4354_p4 = por %p4353_p3, %p4352_p2 }
  0x63   :  { %p4355_p5 = pnand %p4354_p4, %p4348_p1 }
  0x65   :  { %4358 = shalt.err (!%p4355_p5)
}
  0x66   :  { %70 = dma.hbm_to_vmem [thread:$0]  %s4609_s4, 64, %s68_s12, [#allocation9]  }
  0x67   :  { %s4359_s18 = scalar_lea.hbm %s4611_s6, 16 }
  0x68   :  { %p4360_p6 = scmp.ne.s32.totalorder %s4611_s6, %s4359_s18  ;;  %p4363_p7 = scmp.lt.u32.totalorder %s4359_s18, %s4611_s6 }
  0x6a   :  { %p4365_p8 = pnand %p4363_p7, %p4360_p6 }
  0x6c   :  { %4368 = shalt.err (!%p4365_p8)
}
  0x6d   :  { %s4369_s8 = scalar_lea.vmem %s90_s16, 16  ;;  %s4373_s9 = scalar_lea.vmem %s90_s16, 32 }
  0x6e   :  { %p4370_p9 = scmp.ne.s32.totalorder %s90_s16, %s4369_s8  ;;  %p4374_p10 = scmp.lt.s32.totalorder %s90_s16, %s90_s16 }
  0x6f   :  { %p4375_p11 = scmp.lt.s32.totalorder %s4373_s9, %s4369_s8 }
  0x71   :  { %p4376_p12 = por %p4375_p11, %p4374_p10 }
  0x73   :  { %p4377_p13 = pnand %p4376_p12, %p4370_p9 }
  0x75   :  { %4380 = shalt.err (!%p4377_p13)
}
  0x76   :  { %92 = dma.hbm_to_vmem [thread:$0]  %s4611_s6, 16, %s90_s16, [#allocation12]  }
  0x77   :  { %4403 = dma.done.wait [#allocation3], 448  }
  0x78   :  { %4404 = vsyncadd [#allocation3], 4294966848 }
  0x79   :  { %4405 = dma.done.wait [#allocation6], 28736  }
  0x7a   :  { %4406 = vsyncadd [#allocation6], 4294938560 }
  0x7b   :  { %4407 = dma.done.wait [#allocation9], 16448  }
  0x7c   :  { %4408 = vsyncadd [#allocation9], 4294950848 }
  0x7d   :  { %4409 = dma.done.wait [#allocation12], 4112  }
  0x7e   :  { %4410 = vsyncadd [#allocation12], 4294963184  ;;  %v3660_v0 = vld [vmem:[#allocation5 + $0x4] ss:$16 sps:$4 sm:$0xff]   ;;  %v3662_v1 = vld [vmem:[#allocation5 + $0xc] ss:$16 sps:$4 sm:$0xff]  }
  0x7f   :  { %1510 = vmatprep.subr.bf16.mxu0 %v3660_v0  ;;  %v3664_v2 = vld [vmem:[#allocation5] ss:$16 sps:$4 sm:$0xff]   ;;  %v3665_v3 = vld [vmem:[#allocation5 + $0x8] ss:$16 sps:$4 sm:$0xff]   ;;  %1674 = vmatprep.subr.bf16.mxu1 %v3662_v1  ;;  %v3666_v4 = vld [vmem:[#allocation5 + $0x24] ss:$16 sps:$4 sm:$0xff]  }
  0x80   :  { %1511 = vmatpush1.bf16.msra.mxu0 %v3664_v2  ;;  %1675 = vmatpush1.bf16.msra.mxu1 %v3665_v3  ;;  %v3668_v5 = vld [vmem:[#allocation5 + $0x2c] ss:$16 sps:$4 sm:$0xff]   ;;  %v3670_v6 = vld [vmem:[#allocation5 + $0x20] ss:$16 sps:$4 sm:$0xff]   ;;  %v3671_v7 = vld [vmem:[#allocation5 + $0x28] ss:$16 sps:$4 sm:$0xff]  }
  0x81   :  { %1512 = vmatprep.subr.bf16.mxu0 %v3666_v4  ;;  %1676 = vmatprep.subr.bf16.mxu1 %v3668_v5  ;;  %v3672_v8 = vld [vmem:[#allocation5 + $0x44] ss:$16 sps:$4 sm:$0xff]   ;;  %v3674_v9 = vld [vmem:[#allocation5 + $0x4c] ss:$16 sps:$4 sm:$0xff]   ;;  %v3676_v10 = vld [vmem:[#allocation5 + $0x40] ss:$16 sps:$4 sm:$0xff]  }
  0x82   :  { %v3677_v11 = vld [vmem:[#allocation5 + $0x48] ss:$16 sps:$4 sm:$0xff]   ;;  %v3678_v12 = vld [vmem:[#allocation5 + $0x64] ss:$16 sps:$4 sm:$0xff]   ;;  %v3680_v13 = vld [vmem:[#allocation5 + $0x6c] ss:$16 sps:$4 sm:$0xff]  }
  0x83   :  { %v3682_v14 = vld [vmem:[#allocation5 + $0x60] ss:$16 sps:$4 sm:$0xff]   ;;  %v3683_v15 = vld [vmem:[#allocation5 + $0x68] ss:$16 sps:$4 sm:$0xff]   ;;  %v3684_v16 = vld [vmem:[#allocation5 + $0x84] ss:$16 sps:$4 sm:$0xff]  }
  0x84   :  { %1513 = vmatpush1.bf16.msra.mxu0 %v3670_v6  ;;  %1677 = vmatpush1.bf16.msra.mxu1 %v3671_v7  ;;  %v3686_v17 = vld [vmem:[#allocation5 + $0x8c] ss:$16 sps:$4 sm:$0xff]   ;;  %v3688_v18 = vld [vmem:[#allocation5 + $0x80] ss:$16 sps:$4 sm:$0xff]   ;;  %v3689_v19 = vld [vmem:[#allocation5 + $0x88] ss:$16 sps:$4 sm:$0xff]  }
  0x85   :  { %1514 = vmatprep.subr.bf16.mxu0 %v3672_v8  ;;  %1678 = vmatprep.subr.bf16.mxu1 %v3674_v9  ;;  %v3690_v20 = vld [vmem:[#allocation5 + $0xa4] ss:$16 sps:$4 sm:$0xff]   ;;  %v3692_v21 = vld [vmem:[#allocation5 + $0xac] ss:$16 sps:$4 sm:$0xff]   ;;  %v3694_v22 = vld [vmem:[#allocation5 + $0xa0] ss:$16 sps:$4 sm:$0xff]  }
  0x86   :  { %v3695_v23 = vld [vmem:[#allocation5 + $0xa8] ss:$16 sps:$4 sm:$0xff]   ;;  %v3696_v24 = vld [vmem:[#allocation5 + $0xc4] ss:$16 sps:$4 sm:$0xff]   ;;  %v3698_v25 = vld [vmem:[#allocation5 + $0xcc] ss:$16 sps:$4 sm:$0xff]  }
  0x87   :  { %v3700_v26 = vld [vmem:[#allocation5 + $0xc0] ss:$16 sps:$4 sm:$0xff]   ;;  %v3701_v27 = vld [vmem:[#allocation5 + $0xc8] ss:$16 sps:$4 sm:$0xff]   ;;  %v3702_v28 = vld [vmem:[#allocation5 + $0xe4] ss:$16 sps:$4 sm:$0xff]  }
  0x88   :  { %1515 = vmatpush1.bf16.msra.mxu0 %v3676_v10  ;;  %1679 = vmatpush1.bf16.msra.mxu1 %v3677_v11  ;;  %v3704_v29 = vld [vmem:[#allocation5 + $0xec] ss:$16 sps:$4 sm:$0xff]   ;;  %v3706_v30 = vld [vmem:[#allocation5 + $0xe0] ss:$16 sps:$4 sm:$0xff]   ;;  %v3707_v31 = vld [vmem:[#allocation5 + $0xe8] ss:$16 sps:$4 sm:$0xff]  }
  0x89   :  { %1516 = vmatprep.subr.bf16.mxu0 %v3678_v12  ;;  %1680 = vmatprep.subr.bf16.mxu1 %v3680_v13  ;;  %v3708_v32 = vld [vmem:[#allocation5 + $0x104] ss:$16 sps:$4 sm:$0xff]   ;;  %v3710_v33 = vld [vmem:[#allocation5 + $0x10c] ss:$16 sps:$4 sm:$0xff]   ;;  %v3712_v34 = vld [vmem:[#allocation5 + $0x100] ss:$16 sps:$4 sm:$0xff]  }
  0x8a   :  { %v3713_v35 = vld [vmem:[#allocation5 + $0x108] ss:$16 sps:$4 sm:$0xff]   ;;  %v3714_v36 = vld [vmem:[#allocation5 + $0x124] ss:$16 sps:$4 sm:$0xff]   ;;  %v3716_v37 = vld [vmem:[#allocation5 + $0x12c] ss:$16 sps:$4 sm:$0xff]  }
  0x8b   :  { %v3718_v38 = vld [vmem:[#allocation5 + $0x120] ss:$16 sps:$4 sm:$0xff]   ;;  %v3719_v39 = vld [vmem:[#allocation5 + $0x128] ss:$16 sps:$4 sm:$0xff]   ;;  %v3720_v40 = vld [vmem:[#allocation5 + $0x144] ss:$16 sps:$4 sm:$0xff]  }
  0x8c   :  { %1517 = vmatpush1.bf16.msra.mxu0 %v3682_v14  ;;  %1681 = vmatpush1.bf16.msra.mxu1 %v3683_v15  ;;  %v3722_v41 = vld [vmem:[#allocation5 + $0x14c] ss:$16 sps:$4 sm:$0xff]   ;;  %v3724_v42 = vld [vmem:[#allocation5 + $0x140] ss:$16 sps:$4 sm:$0xff]   ;;  %v3725_v43 = vld [vmem:[#allocation5 + $0x148] ss:$16 sps:$4 sm:$0xff]  }
  0x8d   :  { %1518 = vmatprep.subr.bf16.mxu0 %v3684_v16  ;;  %1682 = vmatprep.subr.bf16.mxu1 %v3686_v17  ;;  %v3726_v44 = vld [vmem:[#allocation5 + $0x164] ss:$16 sps:$4 sm:$0xff]   ;;  %v3728_v45 = vld [vmem:[#allocation5 + $0x16c] ss:$16 sps:$4 sm:$0xff]   ;;  %v3730_v47 = vld [vmem:[#allocation5 + $0x160] ss:$16 sps:$4 sm:$0xff]  }
  0x8e   :  { %v115_v46 = vld [vmem:[#allocation2] sm:$0xff]  ;;  %v3734_v51 = vld [vmem:[#allocation5 + $0x18c] ss:$16 sps:$4 sm:$0xff]   ;;  %v3736_v52 = vld [vmem:[#allocation5 + $0x180] ss:$16 sps:$4 sm:$0xff]   ;;  %s4425_s6 = smov [#allocation14]  }
  0x8f   :  { %v3172_v48 = vcombine.high %v115_v46, %v115_v46  ;;  %v3731_v49 = vld [vmem:[#allocation5 + $0x168] ss:$16 sps:$4 sm:$0xff]   ;;  %v3732_v50 = vld [vmem:[#allocation5 + $0x184] ss:$16 sps:$4 sm:$0xff]   ;;  %v3740_v55 = vld [vmem:[#allocation5 + $0x1ac] ss:$16 sps:$4 sm:$0xff]   ;;  %v3171_v4 = vcombine.low %v115_v46, %v115_v46 }
  0x90   :  { %1519 = vmatpush1.bf16.msra.mxu0 %v3688_v18  ;;  %1683 = vmatpush1.bf16.msra.mxu1 %v3689_v19  ;;  %v3737_v53 = vld [vmem:[#allocation5 + $0x188] ss:$16 sps:$4 sm:$0xff]   ;;  %v3738_v54 = vld [vmem:[#allocation5 + $0x1a4] ss:$16 sps:$4 sm:$0xff]   ;;  %v3742_v56 = vld [vmem:[#allocation5 + $0x1a0] ss:$16 sps:$4 sm:$0xff]  }
  0x91   :  { %1520 = vmatprep.subr.bf16.mxu0 %v3690_v20  ;;  %1684 = vmatprep.subr.bf16.mxu1 %v3692_v21  ;;  %v3743_v57 = vld [vmem:[#allocation5 + $0x1a8] ss:$16 sps:$4 sm:$0xff]   ;;  %v3744_v58 = vld [vmem:[#allocation5 + $0x1c4] ss:$16 sps:$4 sm:$0xff]   ;;  %v3746_v59 = vld [vmem:[#allocation5 + $0x1cc] ss:$16 sps:$4 sm:$0xff]  }
  0x92   :  { %1542 = vmatprep.mubr.bf16.mxu0 %v3172_v48  ;;  %1706 = vmatprep.mubr.bf16.mxu1 %v3172_v48  ;;  %v3748_v60 = vld [vmem:[#allocation5 + $0x1c0] ss:$16 sps:$4 sm:$0xff]   ;;  %v3749_v61 = vld [vmem:[#allocation5 + $0x1c8] ss:$16 sps:$4 sm:$0xff]   ;;  %v3750_v62 = vld [vmem:[#allocation5 + $0x1e4] ss:$16 sps:$4 sm:$0xff]  }
  0x93   :  { %v3752_v63 = vld [vmem:[#allocation5 + $0x1ec] ss:$16 sps:$4 sm:$0xff]   ;;  %v3754_v0 = vld [vmem:[#allocation5 + $0x1e0] ss:$16 sps:$4 sm:$0xff]   ;;  %v3755_v1 = vld [vmem:[#allocation5 + $0x1e8] ss:$16 sps:$4 sm:$0xff]  }
  0x94   :  { %1521 = vmatpush1.bf16.msra.mxu0 %v3694_v22  ;;  %1685 = vmatpush1.bf16.msra.mxu1 %v3695_v23  ;;  %v3760_v2 = vld [vmem:[#allocation5 + $0x204] ss:$16 sps:$4 sm:$0xff]   ;;  %v3763_v3 = vld [vmem:[#allocation5 + $0x20c] ss:$16 sps:$4 sm:$0xff]   ;;  %v3758_v5 = vld [vmem:[#allocation5 + $0x200] ss:$16 sps:$4 sm:$0xff]  }
  0x95   :  { %1522 = vmatprep.subr.bf16.mxu0 %v3696_v24  ;;  %1686 = vmatprep.subr.bf16.mxu1 %v3698_v25  ;;  %v3761_v6 = vld [vmem:[#allocation5 + $0x208] ss:$16 sps:$4 sm:$0xff]   ;;  %v3766_v7 = vld [vmem:[#allocation5 + $0x224] ss:$16 sps:$4 sm:$0xff]   ;;  %v3769_v8 = vld [vmem:[#allocation5 + $0x22c] ss:$16 sps:$4 sm:$0xff]  }
  0x96   :  { %v3764_v9 = vld [vmem:[#allocation5 + $0x220] ss:$16 sps:$4 sm:$0xff]   ;;  %v3767_v10 = vld [vmem:[#allocation5 + $0x228] ss:$16 sps:$4 sm:$0xff]   ;;  %v3772_v11 = vld [vmem:[#allocation5 + $0x244] ss:$16 sps:$4 sm:$0xff]  }
  0x97   :  { %v3775_v12 = vld [vmem:[#allocation5 + $0x24c] ss:$16 sps:$4 sm:$0xff]   ;;  %v3770_v13 = vld [vmem:[#allocation5 + $0x240] ss:$16 sps:$4 sm:$0xff]   ;;  %v3773_v14 = vld [vmem:[#allocation5 + $0x248] ss:$16 sps:$4 sm:$0xff]  }
  0x98   :  { %1523 = vmatpush1.bf16.msra.mxu0 %v3700_v26  ;;  %1687 = vmatpush1.bf16.msra.mxu1 %v3701_v27  ;;  %v3778_v15 = vld [vmem:[#allocation5 + $0x264] ss:$16 sps:$4 sm:$0xff]   ;;  %v3781_v16 = vld [vmem:[#allocation5 + $0x26c] ss:$16 sps:$4 sm:$0xff]   ;;  %v3776_v17 = vld [vmem:[#allocation5 + $0x260] ss:$16 sps:$4 sm:$0xff]  }
  0x99   :  { %1524 = vmatprep.subr.bf16.mxu0 %v3702_v28  ;;  %1688 = vmatprep.subr.bf16.mxu1 %v3704_v29  ;;  %v3779_v18 = vld [vmem:[#allocation5 + $0x268] ss:$16 sps:$4 sm:$0xff]   ;;  %v3784_v19 = vld [vmem:[#allocation5 + $0x284] ss:$16 sps:$4 sm:$0xff]   ;;  %v3787_v20 = vld [vmem:[#allocation5 + $0x28c] ss:$16 sps:$4 sm:$0xff]  }
  0x9a   :  { %v3782_v21 = vld [vmem:[#allocation5 + $0x280] ss:$16 sps:$4 sm:$0xff]   ;;  %v3785_v22 = vld [vmem:[#allocation5 + $0x288] ss:$16 sps:$4 sm:$0xff]   ;;  %v3790_v23 = vld [vmem:[#allocation5 + $0x2a4] ss:$16 sps:$4 sm:$0xff]  }
  0x9b   :  { %v3793_v24 = vld [vmem:[#allocation5 + $0x2ac] ss:$16 sps:$4 sm:$0xff]   ;;  %v3788_v25 = vld [vmem:[#allocation5 + $0x2a0] ss:$16 sps:$4 sm:$0xff]   ;;  %v3791_v26 = vld [vmem:[#allocation5 + $0x2a8] ss:$16 sps:$4 sm:$0xff]  }
  0x9c   :  { %1525 = vmatpush1.bf16.msra.mxu0 %v3706_v30  ;;  %1689 = vmatpush1.bf16.msra.mxu1 %v3707_v31  ;;  %v3796_v27 = vld [vmem:[#allocation5 + $0x2c4] ss:$16 sps:$4 sm:$0xff]   ;;  %v3799_v28 = vld [vmem:[#allocation5 + $0x2cc] ss:$16 sps:$4 sm:$0xff]   ;;  %v3794_v31 = vld [vmem:[#allocation5 + $0x2c0] ss:$16 sps:$4 sm:$0xff]  }
  0x9d   :  { %1526 = vmatprep.subr.bf16.mxu0 %v3708_v32  ;;  %1690 = vmatprep.subr.bf16.mxu1 %v3710_v33  ;;  %v4550_v29 = vld [vmem:[#allocation2 + $0x8] sm:$0xff]  ;;  %v3797_v32 = vld [vmem:[#allocation5 + $0x2c8] ss:$16 sps:$4 sm:$0xff]   ;;  %v3802_v33 = vld [vmem:[#allocation5 + $0x2e4] ss:$16 sps:$4 sm:$0xff]   ;;  %s3159_s13 = sshll.u32 %s4425_s6, 4  ;;  %s3160_s13 = int_to_ptr.vmem [resolvable:$true] %s3159_s13 }
  0x9e   :  { %v3174_v30 = vcombine.high %v4550_v29, %v4550_v29  ;;  %v3823_v46 = vld [vmem:[#allocation5 + $0x34c] ss:$16 sps:$4 sm:$0xff]   ;;  %v3821_v48 = vld [vmem:[#allocation5 + $0x348] ss:$16 sps:$4 sm:$0xff]   ;;  %s4381_s14 = scalar_lea.vmem %s3160_s13, 128  ;;  %p4386_p1 = scmp.lt.s32.totalorder %s3160_s13, %s3160_s13 }
  0x9f   :  { %p4382_p0 = scmp.ne.s32.totalorder %s3160_s13, %s4381_s14  ;;  %p4387_p2 = scmp.lt.s32.totalorder %s4381_s14, %s4381_s14 }
  0xa0   :  { %1527 = vmatpush1.bf16.msra.mxu0 %v3712_v34  ;;  %1691 = vmatpush1.bf16.msra.mxu1 %v3713_v35  ;;  %v3805_v34 = vld [vmem:[#allocation5 + $0x2ec] ss:$16 sps:$4 sm:$0xff]   ;;  %v3800_v35 = vld [vmem:[#allocation5 + $0x2e0] ss:$16 sps:$4 sm:$0xff]  }
  0xa1   :  { %1528 = vmatprep.subr.bf16.mxu0 %v3714_v36  ;;  %1692 = vmatprep.subr.bf16.mxu1 %v3716_v37  ;;  %v3803_v36 = vld [vmem:[#allocation5 + $0x2e8] ss:$16 sps:$4 sm:$0xff]   ;;  %v3808_v37 = vld [vmem:[#allocation5 + $0x304] ss:$16 sps:$4 sm:$0xff]   ;;  %p4388_p3 = por %p4387_p2, %p4386_p1 }
  0xa3   :  { %p4389_p4 = pnand %p4388_p3, %p4382_p0 }
  0xa4   :  { %1529 = vmatpush1.bf16.msra.mxu0 %v3718_v38  ;;  %1693 = vmatpush1.bf16.msra.mxu1 %v3719_v39  ;;  %v3811_v38 = vld [vmem:[#allocation5 + $0x30c] ss:$16 sps:$4 sm:$0xff]   ;;  %v3806_v39 = vld [vmem:[#allocation5 + $0x300] ss:$16 sps:$4 sm:$0xff]  }
  0xa5   :  { %1530 = vmatprep.subr.bf16.mxu0 %v3720_v40  ;;  %1694 = vmatprep.subr.bf16.mxu1 %v3722_v41  ;;  %v3809_v40 = vld [vmem:[#allocation5 + $0x308] ss:$16 sps:$4 sm:$0xff]   ;;  %v3814_v41 = vld [vmem:[#allocation5 + $0x324] ss:$16 sps:$4 sm:$0xff]  }
  0xa8   :  { %1531 = vmatpush1.bf16.msra.mxu0 %v3724_v42  ;;  %1695 = vmatpush1.bf16.msra.mxu1 %v3725_v43  ;;  %v3817_v42 = vld [vmem:[#allocation5 + $0x32c] ss:$16 sps:$4 sm:$0xff]   ;;  %v3812_v43 = vld [vmem:[#allocation5 + $0x320] ss:$16 sps:$4 sm:$0xff]  }
  0xa9   :  { %1532 = vmatprep.subr.bf16.mxu0 %v3726_v44  ;;  %1696 = vmatprep.subr.bf16.mxu1 %v3728_v45  ;;  %v3815_v44 = vld [vmem:[#allocation5 + $0x328] ss:$16 sps:$4 sm:$0xff]   ;;  %v3820_v45 = vld [vmem:[#allocation5 + $0x344] ss:$16 sps:$4 sm:$0xff]  }
  0xac   :  { %1533 = vmatpush1.bf16.msra.mxu0 %v3730_v47  ;;  %1697 = vmatpush1.bf16.msra.mxu1 %v3731_v49  ;;  %v3818_v47 = vld [vmem:[#allocation5 + $0x340] ss:$16 sps:$4 sm:$0xff]   ;;  %v3826_v49 = vld [vmem:[#allocation5 + $0x364] ss:$16 sps:$4 sm:$0xff]  }
  0xad   :  { %1534 = vmatprep.subr.bf16.mxu0 %v3732_v50  ;;  %1698 = vmatprep.subr.bf16.mxu1 %v3734_v51  ;;  %v3829_v50 = vld [vmem:[#allocation5 + $0x36c] ss:$16 sps:$4 sm:$0xff]   ;;  %v3824_v51 = vld [vmem:[#allocation5 + $0x360] ss:$16 sps:$4 sm:$0xff]  }
  0xb0   :  { %1535 = vmatpush1.bf16.msra.mxu0 %v3736_v52  ;;  %1699 = vmatpush1.bf16.msra.mxu1 %v3737_v53  ;;  %v3827_v52 = vld [vmem:[#allocation5 + $0x368] ss:$16 sps:$4 sm:$0xff]   ;;  %v3832_v53 = vld [vmem:[#allocation5 + $0x384] ss:$16 sps:$4 sm:$0xff]  }
  0xb1   :  { %1536 = vmatprep.subr.bf16.mxu0 %v3738_v54  ;;  %1700 = vmatprep.subr.bf16.mxu1 %v3740_v55  ;;  %v3835_v54 = vld [vmem:[#allocation5 + $0x38c] ss:$16 sps:$4 sm:$0xff]   ;;  %v3830_v55 = vld [vmem:[#allocation5 + $0x380] ss:$16 sps:$4 sm:$0xff]  }
  0xb4   :  { %1537 = vmatpush1.bf16.msra.mxu0 %v3742_v56  ;;  %1701 = vmatpush1.bf16.msra.mxu1 %v3743_v57  ;;  %v3833_v56 = vld [vmem:[#allocation5 + $0x388] ss:$16 sps:$4 sm:$0xff]   ;;  %v3838_v57 = vld [vmem:[#allocation5 + $0x3a4] ss:$16 sps:$4 sm:$0xff]  }
  0xb5   :  { %1538 = vmatprep.subr.bf16.mxu0 %v3744_v58  ;;  %1702 = vmatprep.subr.bf16.mxu1 %v3746_v59  ;;  %v3841_v58 = vld [vmem:[#allocation5 + $0x3ac] ss:$16 sps:$4 sm:$0xff]   ;;  %v3836_v59 = vld [vmem:[#allocation5 + $0x3a0] ss:$16 sps:$4 sm:$0xff]  }
  0xb8   :  { %1539 = vmatpush1.bf16.msra.mxu0 %v3748_v60  ;;  %1703 = vmatpush1.bf16.msra.mxu1 %v3749_v61  ;;  %v3839_v60 = vld [vmem:[#allocation5 + $0x3a8] ss:$16 sps:$4 sm:$0xff]   ;;  %v3844_v61 = vld [vmem:[#allocation5 + $0x3c4] ss:$16 sps:$4 sm:$0xff]  }
  0xb9   :  { %1540 = vmatprep.subr.bf16.mxu0 %v3750_v62  ;;  %1704 = vmatprep.subr.bf16.mxu1 %v3752_v63  ;;  %v3847_v62 = vld [vmem:[#allocation5 + $0x3cc] ss:$16 sps:$4 sm:$0xff]   ;;  %v3842_v63 = vld [vmem:[#allocation5 + $0x3c0] ss:$16 sps:$4 sm:$0xff]  }
  0xbc   :  { %1541 = vmatpush1.bf16.msra.mxu0 %v3754_v0  ;;  %1705 = vmatpush1.bf16.msra.mxu1 %v3755_v1  ;;  %v3845_v0 = vld [vmem:[#allocation5 + $0x3c8] ss:$16 sps:$4 sm:$0xff]   ;;  %v3850_v1 = vld [vmem:[#allocation5 + $0x3e4] ss:$16 sps:$4 sm:$0xff]  }
  0xbd   :  { %1551 = vmatprep.subr.bf16.mxu0 %v3760_v2  ;;  %1715 = vmatprep.subr.bf16.mxu1 %v3763_v3  ;;  %v3853_v2 = vld [vmem:[#allocation5 + $0x3ec] ss:$16 sps:$4 sm:$0xff]   ;;  %v3848_v3 = vld [vmem:[#allocation5 + $0x3e0] ss:$16 sps:$4 sm:$0xff]  }
  0xbf   :  { %1543 = vmatmul.mubr.bf16.vlgmr.msra.gmra.mrb[0].mxu0 %v3171_v4  ;;  %1707 = vmatmul.mubr.bf16.vlgmr.msra.gmra.mrb[0].mxu1 %v3171_v4  ;;  %v3851_v4 = vld [vmem:[#allocation5 + $0x3e8] ss:$16 sps:$4 sm:$0xff]  }
  0xc0   :  { %1552 = vmatpush1.bf16.msra.mxu0 %v3758_v5  ;;  %1716 = vmatpush1.bf16.msra.mxu1 %v3761_v6  ;;  %v3858_v5 = vld [vmem:[#allocation5 + $0x404] ss:$16 sps:$4 sm:$0xff]   ;;  %v3861_v6 = vld [vmem:[#allocation5 + $0x40c] ss:$16 sps:$4 sm:$0xff]  }
  0xc1   :  { %1553 = vmatprep.subr.bf16.mxu0 %v3766_v7  ;;  %1717 = vmatprep.subr.bf16.mxu1 %v3769_v8  ;;  %v3173_v7 = vcombine.low %v4550_v29, %v4550_v29  ;;  %v3856_v8 = vld [vmem:[#allocation5 + $0x400] ss:$16 sps:$4 sm:$0xff]   ;;  %v3891_v29 = vld [vmem:[#allocation5 + $0x4ac] ss:$16 sps:$4 sm:$0xff]  }
  0xc2   :  { %1583 = vmatprep.mubr.bf16.mxu0 %v3174_v30  ;;  %1747 = vmatprep.mubr.bf16.mxu1 %v3174_v30  ;;  %v3886_v30 = vld [vmem:[#allocation5 + $0x4a0] ss:$16 sps:$4 sm:$0xff]  }
  0xc4   :  { %1554 = vmatpush1.bf16.msra.mxu0 %v3764_v9  ;;  %1718 = vmatpush1.bf16.msra.mxu1 %v3767_v10  ;;  %v3859_v9 = vld [vmem:[#allocation5 + $0x408] ss:$16 sps:$4 sm:$0xff]   ;;  %v3864_v10 = vld [vmem:[#allocation5 + $0x424] ss:$16 sps:$4 sm:$0xff]  }
  0xc5   :  { %1555 = vmatprep.subr.bf16.mxu0 %v3772_v11  ;;  %1719 = vmatprep.subr.bf16.mxu1 %v3775_v12  ;;  %v4556_v11 = vld [vmem:[#allocation2 + $0x10] sm:$0xff]  ;;  %v3867_v12 = vld [vmem:[#allocation5 + $0x42c] ss:$16 sps:$4 sm:$0xff]  }
  0xc8   :  { %1556 = vmatpush1.bf16.msra.mxu0 %v3770_v13  ;;  %1720 = vmatpush1.bf16.msra.mxu1 %v3773_v14  ;;  %v3176_v13 = vcombine.high %v4556_v11, %v4556_v11  ;;  %v3862_v14 = vld [vmem:[#allocation5 + $0x420] ss:$16 sps:$4 sm:$0xff]  }
  0xc9   :  { %1557 = vmatprep.subr.bf16.mxu0 %v3778_v15  ;;  %1721 = vmatprep.subr.bf16.mxu1 %v3781_v16  ;;  %v3865_v15 = vld [vmem:[#allocation5 + $0x428] ss:$16 sps:$4 sm:$0xff]   ;;  %v3870_v16 = vld [vmem:[#allocation5 + $0x444] ss:$16 sps:$4 sm:$0xff]  }
  0xcc   :  { %1558 = vmatpush1.bf16.msra.mxu0 %v3776_v17  ;;  %1722 = vmatpush1.bf16.msra.mxu1 %v3779_v18  ;;  %v3873_v17 = vld [vmem:[#allocation5 + $0x44c] ss:$16 sps:$4 sm:$0xff]   ;;  %v3868_v18 = vld [vmem:[#allocation5 + $0x440] ss:$16 sps:$4 sm:$0xff]  }
  0xcd   :  { %1559 = vmatprep.subr.bf16.mxu0 %v3784_v19  ;;  %1723 = vmatprep.subr.bf16.mxu1 %v3787_v20  ;;  %v3871_v19 = vld [vmem:[#allocation5 + $0x448] ss:$16 sps:$4 sm:$0xff]   ;;  %v3876_v20 = vld [vmem:[#allocation5 + $0x464] ss:$16 sps:$4 sm:$0xff]  }
  0xd0   :  { %1560 = vmatpush1.bf16.msra.mxu0 %v3782_v21  ;;  %1724 = vmatpush1.bf16.msra.mxu1 %v3785_v22  ;;  %v3879_v21 = vld [vmem:[#allocation5 + $0x46c] ss:$16 sps:$4 sm:$0xff]   ;;  %v3874_v22 = vld [vmem:[#allocation5 + $0x460] ss:$16 sps:$4 sm:$0xff]  }
  0xd1   :  { %1561 = vmatprep.subr.bf16.mxu0 %v3790_v23  ;;  %1725 = vmatprep.subr.bf16.mxu1 %v3793_v24  ;;  %v3877_v23 = vld [vmem:[#allocation5 + $0x468] ss:$16 sps:$4 sm:$0xff]   ;;  %v3882_v24 = vld [vmem:[#allocation5 + $0x484] ss:$16 sps:$4 sm:$0xff]  }
  0xd4   :  { %1562 = vmatpush1.bf16.msra.mxu0 %v3788_v25  ;;  %1726 = vmatpush1.bf16.msra.mxu1 %v3791_v26  ;;  %v3885_v25 = vld [vmem:[#allocation5 + $0x48c] ss:$16 sps:$4 sm:$0xff]   ;;  %v3880_v26 = vld [vmem:[#allocation5 + $0x480] ss:$16 sps:$4 sm:$0xff]  }
  0xd5   :  { %1563 = vmatprep.subr.bf16.mxu0 %v3796_v27  ;;  %1727 = vmatprep.subr.bf16.mxu1 %v3799_v28  ;;  %v3883_v27 = vld [vmem:[#allocation5 + $0x488] ss:$16 sps:$4 sm:$0xff]   ;;  %v3888_v28 = vld [vmem:[#allocation5 + $0x4a4] ss:$16 sps:$4 sm:$0xff]  }
  0xd8   :  { %1564 = vmatpush1.bf16.msra.mxu0 %v3794_v31  ;;  %1728 = vmatpush1.bf16.msra.mxu1 %v3797_v32  ;;  %v3889_v31 = vld [vmem:[#allocation5 + $0x4a8] ss:$16 sps:$4 sm:$0xff]   ;;  %v3894_v32 = vld [vmem:[#allocation5 + $0x4c4] ss:$16 sps:$4 sm:$0xff]  }
  0xd9   :  { %1565 = vmatprep.subr.bf16.mxu0 %v3802_v33  ;;  %1729 = vmatprep.subr.bf16.mxu1 %v3805_v34  ;;  %v3897_v33 = vld [vmem:[#allocation5 + $0x4cc] ss:$16 sps:$4 sm:$0xff]   ;;  %v3892_v34 = vld [vmem:[#allocation5 + $0x4c0] ss:$16 sps:$4 sm:$0xff]  }
  0xdc   :  { %1566 = vmatpush1.bf16.msra.mxu0 %v3800_v35  ;;  %1730 = vmatpush1.bf16.msra.mxu1 %v3803_v36  ;;  %v3895_v35 = vld [vmem:[#allocation5 + $0x4c8] ss:$16 sps:$4 sm:$0xff]   ;;  %v3900_v36 = vld [vmem:[#allocation5 + $0x4e4] ss:$16 sps:$4 sm:$0xff]  }
  0xdd   :  { %1567 = vmatprep.subr.bf16.mxu0 %v3808_v37  ;;  %1731 = vmatprep.subr.bf16.mxu1 %v3811_v38  ;;  %v3903_v37 = vld [vmem:[#allocation5 + $0x4ec] ss:$16 sps:$4 sm:$0xff]   ;;  %v3898_v38 = vld [vmem:[#allocation5 + $0x4e0] ss:$16 sps:$4 sm:$0xff]  }
  0xe0   :  { %1568 = vmatpush1.bf16.msra.mxu0 %v3806_v39  ;;  %1732 = vmatpush1.bf16.msra.mxu1 %v3809_v40  ;;  %v3901_v39 = vld [vmem:[#allocation5 + $0x4e8] ss:$16 sps:$4 sm:$0xff]   ;;  %v3906_v40 = vld [vmem:[#allocation5 + $0x504] ss:$16 sps:$4 sm:$0xff]  }
  0xe1   :  { %1569 = vmatprep.subr.bf16.mxu0 %v3814_v41  ;;  %1733 = vmatprep.subr.bf16.mxu1 %v3817_v42  ;;  %v3909_v41 = vld [vmem:[#allocation5 + $0x50c] ss:$16 sps:$4 sm:$0xff]   ;;  %v3904_v42 = vld [vmem:[#allocation5 + $0x500] ss:$16 sps:$4 sm:$0xff]  }
  0xe4   :  { %1570 = vmatpush1.bf16.msra.mxu0 %v3812_v43  ;;  %1734 = vmatpush1.bf16.msra.mxu1 %v3815_v44  ;;  %v3907_v43 = vld [vmem:[#allocation5 + $0x508] ss:$16 sps:$4 sm:$0xff]   ;;  %v3912_v44 = vld [vmem:[#allocation5 + $0x524] ss:$16 sps:$4 sm:$0xff]  }
  0xe5   :  { %1571 = vmatprep.subr.bf16.mxu0 %v3820_v45  ;;  %1735 = vmatprep.subr.bf16.mxu1 %v3823_v46  ;;  %v3915_v45 = vld [vmem:[#allocation5 + $0x52c] ss:$16 sps:$4 sm:$0xff]   ;;  %v3910_v46 = vld [vmem:[#allocation5 + $0x520] ss:$16 sps:$4 sm:$0xff]  }
  0xe8   :  { %1572 = vmatpush1.bf16.msra.mxu0 %v3818_v47  ;;  %1736 = vmatpush1.bf16.msra.mxu1 %v3821_v48  ;;  %v3913_v47 = vld [vmem:[#allocation5 + $0x528] ss:$16 sps:$4 sm:$0xff]   ;;  %v3918_v48 = vld [vmem:[#allocation5 + $0x544] ss:$16 sps:$4 sm:$0xff]  }
  0xe9   :  { %1573 = vmatprep.subr.bf16.mxu0 %v3826_v49  ;;  %1737 = vmatprep.subr.bf16.mxu1 %v3829_v50  ;;  %v3921_v49 = vld [vmem:[#allocation5 + $0x54c] ss:$16 sps:$4 sm:$0xff]   ;;  %v3916_v50 = vld [vmem:[#allocation5 + $0x540] ss:$16 sps:$4 sm:$0xff]  }
  0xec   :  { %1574 = vmatpush1.bf16.msra.mxu0 %v3824_v51  ;;  %1738 = vmatpush1.bf16.msra.mxu1 %v3827_v52  ;;  %v3919_v51 = vld [vmem:[#allocation5 + $0x548] ss:$16 sps:$4 sm:$0xff]   ;;  %v3924_v52 = vld [vmem:[#allocation5 + $0x564] ss:$16 sps:$4 sm:$0xff]  }
  0xed   :  { %1575 = vmatprep.subr.bf16.mxu0 %v3832_v53  ;;  %1739 = vmatprep.subr.bf16.mxu1 %v3835_v54  ;;  %v3927_v53 = vld [vmem:[#allocation5 + $0x56c] ss:$16 sps:$4 sm:$0xff]   ;;  %v3922_v54 = vld [vmem:[#allocation5 + $0x560] ss:$16 sps:$4 sm:$0xff]  }
  0xf0   :  { %1576 = vmatpush1.bf16.msra.mxu0 %v3830_v55  ;;  %1740 = vmatpush1.bf16.msra.mxu1 %v3833_v56  ;;  %v3925_v55 = vld [vmem:[#allocation5 + $0x568] ss:$16 sps:$4 sm:$0xff]   ;;  %v3930_v56 = vld [vmem:[#allocation5 + $0x584] ss:$16 sps:$4 sm:$0xff]  }
  0xf1   :  { %1577 = vmatprep.subr.bf16.mxu0 %v3838_v57  ;;  %1741 = vmatprep.subr.bf16.mxu1 %v3841_v58  ;;  %v3933_v57 = vld [vmem:[#allocation5 + $0x58c] ss:$16 sps:$4 sm:$0xff]   ;;  %v3928_v58 = vld [vmem:[#allocation5 + $0x580] ss:$16 sps:$4 sm:$0xff]  }
  0xf4   :  { %1578 = vmatpush1.bf16.msra.mxu0 %v3836_v59  ;;  %1742 = vmatpush1.bf16.msra.mxu1 %v3839_v60  ;;  %v3931_v59 = vld [vmem:[#allocation5 + $0x588] ss:$16 sps:$4 sm:$0xff]   ;;  %v3936_v60 = vld [vmem:[#allocation5 + $0x5a4] ss:$16 sps:$4 sm:$0xff]  }
  0xf5   :  { %1579 = vmatprep.subr.bf16.mxu0 %v3844_v61  ;;  %1743 = vmatprep.subr.bf16.mxu1 %v3847_v62  ;;  %v3939_v61 = vld [vmem:[#allocation5 + $0x5ac] ss:$16 sps:$4 sm:$0xff]   ;;  %v3934_v62 = vld [vmem:[#allocation5 + $0x5a0] ss:$16 sps:$4 sm:$0xff]  }
  0xf8   :  { %1580 = vmatpush1.bf16.msra.mxu0 %v3842_v63  ;;  %1744 = vmatpush1.bf16.msra.mxu1 %v3845_v0  ;;  %v3937_v63 = vld [vmem:[#allocation5 + $0x5a8] ss:$16 sps:$4 sm:$0xff]   ;;  %v3942_v0 = vld [vmem:[#allocation5 + $0x5c4] ss:$16 sps:$4 sm:$0xff]  }
  0xf9   :  { %1581 = vmatprep.subr.bf16.mxu0 %v3850_v1  ;;  %1745 = vmatprep.subr.bf16.mxu1 %v3853_v2  ;;  %v3945_v1 = vld [vmem:[#allocation5 + $0x5cc] ss:$16 sps:$4 sm:$0xff]   ;;  %v3940_v2 = vld [vmem:[#allocation5 + $0x5c0] ss:$16 sps:$4 sm:$0xff]  }
  0xfc   :  { %1582 = vmatpush1.bf16.msra.mxu0 %v3848_v3  ;;  %1746 = vmatpush1.bf16.msra.mxu1 %v3851_v4  ;;  %v3943_v3 = vld [vmem:[#allocation5 + $0x5c8] ss:$16 sps:$4 sm:$0xff]   ;;  %v3948_v4 = vld [vmem:[#allocation5 + $0x5e4] ss:$16 sps:$4 sm:$0xff]  }
  0xfd   :  { %1592 = vmatprep.subr.bf16.mxu0 %v3858_v5  ;;  %1756 = vmatprep.subr.bf16.mxu1 %v3861_v6  ;;  %v3951_v5 = vld [vmem:[#allocation5 + $0x5ec] ss:$16 sps:$4 sm:$0xff]   ;;  %v3946_v6 = vld [vmem:[#allocation5 + $0x5e0] ss:$16 sps:$4 sm:$0xff]  }
  0xff   :  { %1584 = vmatmul.mubr.bf16.vlgmr.msra.gmra.mrb[0].mxu0 %v3173_v7  ;;  %1748 = vmatmul.mubr.bf16.vlgmr.msra.gmra.mrb[0].mxu1 %v3173_v7  ;;  %v3949_v7 = vld [vmem:[#allocation5 + $0x5e8] ss:$16 sps:$4 sm:$0xff]  }
 0x100   :  { %1593 = vmatpush1.bf16.msra.mxu0 %v3856_v8  ;;  %1757 = vmatpush1.bf16.msra.mxu1 %v3859_v9  ;;  %v3956_v8 = vld [vmem:[#allocation5 + $0x604] ss:$16 sps:$4 sm:$0xff]   ;;  %v3959_v9 = vld [vmem:[#allocation5 + $0x60c] ss:$16 sps:$4 sm:$0xff]  }
 0x101   :  { %1594 = vmatprep.subr.bf16.mxu0 %v3864_v10  ;;  %1758 = vmatprep.subr.bf16.mxu1 %v3867_v12  ;;  %v3954_v10 = vld [vmem:[#allocation5 + $0x600] ss:$16 sps:$4 sm:$0xff]   ;;  %v3957_v12 = vld [vmem:[#allocation5 + $0x608] ss:$16 sps:$4 sm:$0xff]  }
 0x102   :  { %1624 = vmatprep.mubr.bf16.mxu0 %v3176_v13  ;;  %1788 = vmatprep.mubr.bf16.mxu1 %v3176_v13  ;;  %v3175_v13 = vcombine.low %v4556_v11, %v4556_v11  ;;  %v3974_v11 = vld [vmem:[#allocation5 + $0x664] ss:$16 sps:$4 sm:$0xff]  }
 0x104   :  { %1595 = vmatpush1.bf16.msra.mxu0 %v3862_v14  ;;  %1759 = vmatpush1.bf16.msra.mxu1 %v3865_v15  ;;  %v3962_v14 = vld [vmem:[#allocation5 + $0x624] ss:$16 sps:$4 sm:$0xff]   ;;  %v3965_v15 = vld [vmem:[#allocation5 + $0x62c] ss:$16 sps:$4 sm:$0xff]  }
 0x105   :  { %1596 = vmatprep.subr.bf16.mxu0 %v3870_v16  ;;  %1760 = vmatprep.subr.bf16.mxu1 %v3873_v17  ;;  %v3960_v16 = vld [vmem:[#allocation5 + $0x620] ss:$16 sps:$4 sm:$0xff]   ;;  %v3963_v17 = vld [vmem:[#allocation5 + $0x628] ss:$16 sps:$4 sm:$0xff]  }
 0x108   :  { %1597 = vmatpush1.bf16.msra.mxu0 %v3868_v18  ;;  %1761 = vmatpush1.bf16.msra.mxu1 %v3871_v19  ;;  %v3968_v18 = vld [vmem:[#allocation5 + $0x644] ss:$16 sps:$4 sm:$0xff]   ;;  %v3971_v19 = vld [vmem:[#allocation5 + $0x64c] ss:$16 sps:$4 sm:$0xff]  }
 0x109   :  { %1598 = vmatprep.subr.bf16.mxu0 %v3876_v20  ;;  %1762 = vmatprep.subr.bf16.mxu1 %v3879_v21  ;;  %v3966_v20 = vld [vmem:[#allocation5 + $0x640] ss:$16 sps:$4 sm:$0xff]   ;;  %v3969_v21 = vld [vmem:[#allocation5 + $0x648] ss:$16 sps:$4 sm:$0xff]  }
 0x10c   :  { %1599 = vmatpush1.bf16.msra.mxu0 %v3874_v22  ;;  %1763 = vmatpush1.bf16.msra.mxu1 %v3877_v23  ;;  %v4424_v22 = vmov 0   ;;  %v3977_v23 = vld [vmem:[#allocation5 + $0x66c] ss:$16 sps:$4 sm:$0xff]  }
 0x10d   :  { %1600 = vmatprep.subr.bf16.mxu0 %v3882_v24  ;;  %1764 = vmatprep.subr.bf16.mxu1 %v3885_v25  ;;  %v3972_v24 = vld [vmem:[#allocation5 + $0x660] ss:$16 sps:$4 sm:$0xff]   ;;  %v3975_v25 = vld [vmem:[#allocation5 + $0x668] ss:$16 sps:$4 sm:$0xff]  }
 0x110   :  { %1601 = vmatpush1.bf16.msra.mxu0 %v3880_v26  ;;  %1765 = vmatpush1.bf16.msra.mxu1 %v3883_v27  ;;  %v3980_v26 = vld [vmem:[#allocation5 + $0x684] ss:$16 sps:$4 sm:$0xff]   ;;  %v3983_v27 = vld [vmem:[#allocation5 + $0x68c] ss:$16 sps:$4 sm:$0xff]  }
 0x111   :  { %1602 = vmatprep.subr.bf16.mxu0 %v3888_v28  ;;  %1766 = vmatprep.subr.bf16.mxu1 %v3891_v29  ;;  %v3978_v28 = vld [vmem:[#allocation5 + $0x680] ss:$16 sps:$4 sm:$0xff]   ;;  %v3981_v29 = vld [vmem:[#allocation5 + $0x688] ss:$16 sps:$4 sm:$0xff]  }
 0x114   :  { %1603 = vmatpush1.bf16.msra.mxu0 %v3886_v30  ;;  %1767 = vmatpush1.bf16.msra.mxu1 %v3889_v31  ;;  %v3986_v30 = vld [vmem:[#allocation5 + $0x6a4] ss:$16 sps:$4 sm:$0xff]   ;;  %v3989_v31 = vld [vmem:[#allocation5 + $0x6ac] ss:$16 sps:$4 sm:$0xff]  }
 0x115   :  { %1604 = vmatprep.subr.bf16.mxu0 %v3894_v32  ;;  %1768 = vmatprep.subr.bf16.mxu1 %v3897_v33  ;;  %v3984_v32 = vld [vmem:[#allocation5 + $0x6a0] ss:$16 sps:$4 sm:$0xff]   ;;  %v3987_v33 = vld [vmem:[#allocation5 + $0x6a8] ss:$16 sps:$4 sm:$0xff]  }
 0x118   :  { %1605 = vmatpush1.bf16.msra.mxu0 %v3892_v34  ;;  %1769 = vmatpush1.bf16.msra.mxu1 %v3895_v35  ;;  %v3992_v34 = vld [vmem:[#allocation5 + $0x6c4] ss:$16 sps:$4 sm:$0xff]   ;;  %v3995_v35 = vld [vmem:[#allocation5 + $0x6cc] ss:$16 sps:$4 sm:$0xff]  }
 0x119   :  { %1606 = vmatprep.subr.bf16.mxu0 %v3900_v36  ;;  %1770 = vmatprep.subr.bf16.mxu1 %v3903_v37  ;;  %v3990_v36 = vld [vmem:[#allocation5 + $0x6c0] ss:$16 sps:$4 sm:$0xff]   ;;  %v3993_v37 = vld [vmem:[#allocation5 + $0x6c8] ss:$16 sps:$4 sm:$0xff]  }
 0x11c   :  { %1607 = vmatpush1.bf16.msra.mxu0 %v3898_v38  ;;  %1771 = vmatpush1.bf16.msra.mxu1 %v3901_v39  ;;  %v3998_v38 = vld [vmem:[#allocation5 + $0x6e4] ss:$16 sps:$4 sm:$0xff]   ;;  %v4001_v39 = vld [vmem:[#allocation5 + $0x6ec] ss:$16 sps:$4 sm:$0xff]  }
 0x11d   :  { %1608 = vmatprep.subr.bf16.mxu0 %v3906_v40  ;;  %1772 = vmatprep.subr.bf16.mxu1 %v3909_v41  ;;  %v3996_v40 = vld [vmem:[#allocation5 + $0x6e0] ss:$16 sps:$4 sm:$0xff]   ;;  %v3999_v41 = vld [vmem:[#allocation5 + $0x6e8] ss:$16 sps:$4 sm:$0xff]  }
 0x120   :  { %1609 = vmatpush1.bf16.msra.mxu0 %v3904_v42  ;;  %1773 = vmatpush1.bf16.msra.mxu1 %v3907_v43  ;;  %v4005_v42 = vld [vmem:[#allocation8 + $0x4] ss:$16 sps:$4 sm:$0xff]   ;;  %v4008_v43 = vld [vmem:[#allocation8 + $0xc] ss:$16 sps:$4 sm:$0xff]  }
 0x121   :  { %1610 = vmatprep.subr.bf16.mxu0 %v3912_v44  ;;  %1774 = vmatprep.subr.bf16.mxu1 %v3915_v45  ;;  %v4002_v44 = vld [vmem:[#allocation2 + $0x18] ss:$0 sps:$4 sm:$0xff]   ;;  %v4003_v45 = vld [vmem:[#allocation8] ss:$16 sps:$4 sm:$0xff]  }
 0x124   :  { %1611 = vmatpush1.bf16.msra.mxu0 %v3910_v46  ;;  %1775 = vmatpush1.bf16.msra.mxu1 %v3913_v47  ;;  %v4006_v46 = vld [vmem:[#allocation8 + $0x8] ss:$16 sps:$4 sm:$0xff]   ;;  %v4011_v47 = vld [vmem:[#allocation8 + $0x24] ss:$16 sps:$4 sm:$0xff]  }
 0x125   :  { %1612 = vmatprep.subr.bf16.mxu0 %v3918_v48  ;;  %1776 = vmatprep.subr.bf16.mxu1 %v3921_v49  ;;  %v4014_v48 = vld [vmem:[#allocation8 + $0x2c] ss:$16 sps:$4 sm:$0xff]   ;;  %v4009_v49 = vld [vmem:[#allocation8 + $0x20] ss:$16 sps:$4 sm:$0xff]  }
 0x128   :  { %1613 = vmatpush1.bf16.msra.mxu0 %v3916_v50  ;;  %1777 = vmatpush1.bf16.msra.mxu1 %v3919_v51  ;;  %v4012_v50 = vld [vmem:[#allocation8 + $0x28] ss:$16 sps:$4 sm:$0xff]   ;;  %v4017_v51 = vld [vmem:[#allocation8 + $0x44] ss:$16 sps:$4 sm:$0xff]  }
 0x129   :  { %1614 = vmatprep.subr.bf16.mxu0 %v3924_v52  ;;  %1778 = vmatprep.subr.bf16.mxu1 %v3927_v53  ;;  %v4020_v52 = vld [vmem:[#allocation8 + $0x4c] ss:$16 sps:$4 sm:$0xff]   ;;  %v4015_v53 = vld [vmem:[#allocation8 + $0x40] ss:$16 sps:$4 sm:$0xff]  }
 0x12c   :  { %1615 = vmatpush1.bf16.msra.mxu0 %v3922_v54  ;;  %1779 = vmatpush1.bf16.msra.mxu1 %v3925_v55  ;;  %v4018_v54 = vld [vmem:[#allocation8 + $0x48] ss:$16 sps:$4 sm:$0xff]   ;;  %v4023_v55 = vld [vmem:[#allocation8 + $0x64] ss:$16 sps:$4 sm:$0xff]  }
 0x12d   :  { %1616 = vmatprep.subr.bf16.mxu0 %v3930_v56  ;;  %1780 = vmatprep.subr.bf16.mxu1 %v3933_v57  ;;  %v4026_v56 = vld [vmem:[#allocation8 + $0x6c] ss:$16 sps:$4 sm:$0xff]   ;;  %v4021_v57 = vld [vmem:[#allocation8 + $0x60] ss:$16 sps:$4 sm:$0xff]  }
 0x130   :  { %1617 = vmatpush1.bf16.msra.mxu0 %v3928_v58  ;;  %1781 = vmatpush1.bf16.msra.mxu1 %v3931_v59  ;;  %v4024_v58 = vld [vmem:[#allocation8 + $0x68] ss:$16 sps:$4 sm:$0xff]   ;;  %v4029_v59 = vld [vmem:[#allocation8 + $0x84] ss:$16 sps:$4 sm:$0xff]  }
 0x131   :  { %1618 = vmatprep.subr.bf16.mxu0 %v3936_v60  ;;  %1782 = vmatprep.subr.bf16.mxu1 %v3939_v61  ;;  %v4032_v60 = vld [vmem:[#allocation8 + $0x8c] ss:$16 sps:$4 sm:$0xff]   ;;  %v4027_v61 = vld [vmem:[#allocation8 + $0x80] ss:$16 sps:$4 sm:$0xff]  }
 0x134   :  { %1619 = vmatpush1.bf16.msra.mxu0 %v3934_v62  ;;  %1783 = vmatpush1.bf16.msra.mxu1 %v3937_v63  ;;  %v4030_v62 = vld [vmem:[#allocation8 + $0x88] ss:$16 sps:$4 sm:$0xff]   ;;  %v4035_v63 = vld [vmem:[#allocation8 + $0xa4] ss:$16 sps:$4 sm:$0xff]  }
 0x135   :  { %1620 = vmatprep.subr.bf16.mxu0 %v3942_v0  ;;  %1784 = vmatprep.subr.bf16.mxu1 %v3945_v1  ;;  %v4038_v0 = vld [vmem:[#allocation8 + $0xac] ss:$16 sps:$4 sm:$0xff]   ;;  %v4033_v1 = vld [vmem:[#allocation8 + $0xa0] ss:$16 sps:$4 sm:$0xff]  }
 0x138   :  { %1621 = vmatpush1.bf16.msra.mxu0 %v3940_v2  ;;  %1785 = vmatpush1.bf16.msra.mxu1 %v3943_v3  ;;  %v4036_v2 = vld [vmem:[#allocation8 + $0xa8] ss:$16 sps:$4 sm:$0xff]   ;;  %v4041_v3 = vld [vmem:[#allocation8 + $0xc4] ss:$16 sps:$4 sm:$0xff]  }
 0x139   :  { %1622 = vmatprep.subr.bf16.mxu0 %v3948_v4  ;;  %1786 = vmatprep.subr.bf16.mxu1 %v3951_v5  ;;  %v4044_v4 = vld [vmem:[#allocation8 + $0xcc] ss:$16 sps:$4 sm:$0xff]   ;;  %v4039_v5 = vld [vmem:[#allocation8 + $0xc0] ss:$16 sps:$4 sm:$0xff]  }
 0x13c   :  { %1623 = vmatpush1.bf16.msra.mxu0 %v3946_v6  ;;  %1787 = vmatpush1.bf16.msra.mxu1 %v3949_v7  ;;  %v4042_v6 = vld [vmem:[#allocation8 + $0xc8] ss:$16 sps:$4 sm:$0xff]   ;;  %v4047_v7 = vld [vmem:[#allocation8 + $0xe4] ss:$16 sps:$4 sm:$0xff]  }
 0x13d   :  { %1633 = vmatprep.subr.bf16.mxu0 %v3956_v8  ;;  %1797 = vmatprep.subr.bf16.mxu1 %v3959_v9  ;;  %v4050_v8 = vld [vmem:[#allocation8 + $0xec] ss:$16 sps:$4 sm:$0xff]   ;;  %v4045_v9 = vld [vmem:[#allocation8 + $0xe0] ss:$16 sps:$4 sm:$0xff]  }
 0x13f   :  { %1625 = vmatmul.mubr.bf16.vlgmr.msra.gmra.mrb[0].mxu0 %v3175_v13  ;;  %1789 = vmatmul.mubr.bf16.vlgmr.msra.gmra.mrb[0].mxu1 %v3175_v13  ;;  %v4056_v13 = vld [vmem:[#allocation8 + $0x10c] ss:$16 sps:$4 sm:$0xff]  }
 0x140   :  { %1634 = vmatpush1.bf16.msra.mxu0 %v3954_v10  ;;  %1798 = vmatpush1.bf16.msra.mxu1 %v3957_v12  ;;  %v4048_v10 = vld [vmem:[#allocation8 + $0xe8] ss:$16 sps:$4 sm:$0xff]   ;;  %v4053_v12 = vld [vmem:[#allocation8 + $0x104] ss:$16 sps:$4 sm:$0xff]  }
 0x141   :  { %1635 = vmatprep.subr.bf16.mxu0 %v3962_v14  ;;  %1799 = vmatprep.subr.bf16.mxu1 %v3965_v15  ;;  %v4051_v14 = vld [vmem:[#allocation8 + $0x100] ss:$16 sps:$4 sm:$0xff]   ;;  %v4054_v15 = vld [vmem:[#allocation8 + $0x108] ss:$16 sps:$4 sm:$0xff]  }
 0x142   :  { %1665 = vmatprep.mubr.bf16.mxu0 %v4424_v22  ;;  %1829 = vmatprep.mubr.bf16.mxu1 %v4424_v22  ;;  %v4063_v22 = vld [vmem:[#allocation8 + $0x140] ss:$16 sps:$4 sm:$0xff]  }
 0x144   :  { %1636 = vmatpush1.bf16.msra.mxu0 %v3960_v16  ;;  %1800 = vmatpush1.bf16.msra.mxu1 %v3963_v17  ;;  %v4059_v16 = vld [vmem:[#allocation8 + $0x124] ss:$16 sps:$4 sm:$0xff]   ;;  %v4062_v17 = vld [vmem:[#allocation8 + $0x12c] ss:$16 sps:$4 sm:$0xff]  }
 0x145   :  { %1637 = vmatprep.subr.bf16.mxu0 %v3968_v18  ;;  %1801 = vmatprep.subr.bf16.mxu1 %v3971_v19  ;;  %v4057_v18 = vld [vmem:[#allocation8 + $0x120] ss:$16 sps:$4 sm:$0xff]   ;;  %v4060_v19 = vld [vmem:[#allocation8 + $0x128] ss:$16 sps:$4 sm:$0xff]  }
 0x148   :  { %1638 = vmatpush1.bf16.msra.mxu0 %v3966_v20  ;;  %1802 = vmatpush1.bf16.msra.mxu1 %v3969_v21  ;;  %v4065_v20 = vld [vmem:[#allocation8 + $0x144] ss:$16 sps:$4 sm:$0xff]   ;;  %v4068_v21 = vld [vmem:[#allocation8 + $0x14c] ss:$16 sps:$4 sm:$0xff]  }
 0x149   :  { %1639 = vmatprep.subr.bf16.mxu0 %v3974_v11  ;;  %1803 = vmatprep.subr.bf16.mxu1 %v3977_v23  ;;  %v4066_v11 = vld [vmem:[#allocation8 + $0x148] ss:$16 sps:$4 sm:$0xff]   ;;  %v4071_v23 = vld [vmem:[#allocation8 + $0x164] ss:$16 sps:$4 sm:$0xff]  }
 0x14c   :  { %1640 = vmatpush1.bf16.msra.mxu0 %v3972_v24  ;;  %1804 = vmatpush1.bf16.msra.mxu1 %v3975_v25  ;;  %v4074_v24 = vld [vmem:[#allocation8 + $0x16c] ss:$16 sps:$4 sm:$0xff]   ;;  %v4069_v25 = vld [vmem:[#allocation8 + $0x160] ss:$16 sps:$4 sm:$0xff]  }
 0x14d   :  { %1641 = vmatprep.subr.bf16.mxu0 %v3980_v26  ;;  %1805 = vmatprep.subr.bf16.mxu1 %v3983_v27  ;;  %v4072_v26 = vld [vmem:[#allocation8 + $0x168] ss:$16 sps:$4 sm:$0xff]   ;;  %v4077_v27 = vld [vmem:[#allocation8 + $0x184] ss:$16 sps:$4 sm:$0xff]  }
 0x150   :  { %1642 = vmatpush1.bf16.msra.mxu0 %v3978_v28  ;;  %1806 = vmatpush1.bf16.msra.mxu1 %v3981_v29  ;;  %v4080_v28 = vld [vmem:[#allocation8 + $0x18c] ss:$16 sps:$4 sm:$0xff]   ;;  %v4075_v29 = vld [vmem:[#allocation8 + $0x180] ss:$16 sps:$4 sm:$0xff]  }
 0x151   :  { %1643 = vmatprep.subr.bf16.mxu0 %v3986_v30  ;;  %1807 = vmatprep.subr.bf16.mxu1 %v3989_v31  ;;  %v4078_v30 = vld [vmem:[#allocation8 + $0x188] ss:$16 sps:$4 sm:$0xff]   ;;  %v4083_v31 = vld [vmem:[#allocation8 + $0x1a4] ss:$16 sps:$4 sm:$0xff]  }
 0x154   :  { %1644 = vmatpush1.bf16.msra.mxu0 %v3984_v32  ;;  %1808 = vmatpush1.bf16.msra.mxu1 %v3987_v33  ;;  %v4086_v32 = vld [vmem:[#allocation8 + $0x1ac] ss:$16 sps:$4 sm:$0xff]   ;;  %v4081_v33 = vld [vmem:[#allocation8 + $0x1a0] ss:$16 sps:$4 sm:$0xff]  }
 0x155   :  { %1645 = vmatprep.subr.bf16.mxu0 %v3992_v34  ;;  %1809 = vmatprep.subr.bf16.mxu1 %v3995_v35  ;;  %v4084_v34 = vld [vmem:[#allocation8 + $0x1a8] ss:$16 sps:$4 sm:$0xff]   ;;  %v4089_v35 = vld [vmem:[#allocation8 + $0x1c4] ss:$16 sps:$4 sm:$0xff]  }
 0x158   :  { %1646 = vmatpush1.bf16.msra.mxu0 %v3990_v36  ;;  %1810 = vmatpush1.bf16.msra.mxu1 %v3993_v37  ;;  %v4092_v36 = vld [vmem:[#allocation8 + $0x1cc] ss:$16 sps:$4 sm:$0xff]   ;;  %v4087_v37 = vld [vmem:[#allocation8 + $0x1c0] ss:$16 sps:$4 sm:$0xff]  }
 0x159   :  { %1647 = vmatprep.subr.bf16.mxu0 %v3998_v38  ;;  %1811 = vmatprep.subr.bf16.mxu1 %v4001_v39  ;;  %v4090_v38 = vld [vmem:[#allocation8 + $0x1c8] ss:$16 sps:$4 sm:$0xff]   ;;  %v4095_v39 = vld [vmem:[#allocation8 + $0x1e4] ss:$16 sps:$4 sm:$0xff]  }
 0x15c   :  { %1648 = vmatpush1.bf16.msra.mxu0 %v3996_v40  ;;  %1812 = vmatpush1.bf16.msra.mxu1 %v3999_v41  ;;  %v4098_v40 = vld [vmem:[#allocation8 + $0x1ec] ss:$16 sps:$4 sm:$0xff]   ;;  %v4093_v41 = vld [vmem:[#allocation8 + $0x1e0] ss:$16 sps:$4 sm:$0xff]  }
 0x15d   :  { %2636 = vmatprep.subr.bf16.mxu0 %v4005_v42  ;;  %2718 = vmatprep.subr.bf16.mxu1 %v4008_v43  ;;  %v4096_v42 = vld [vmem:[#allocation8 + $0x1e8] ss:$16 sps:$4 sm:$0xff]   ;;  %v4101_v43 = vld [vmem:[#allocation8 + $0x204] ss:$16 sps:$4 sm:$0xff]  }
 0x15f   :  { %1666 = vmatmul.mubr.bf16.vlgmr.msra.gmra.mrb[0].mxu0 %v4002_v44  ;;  %1830 = vmatmul.mubr.bf16.vlgmr.msra.gmra.mrb[0].mxu1 %v4002_v44  ;;  %v4104_v44 = vld [vmem:[#allocation8 + $0x20c] ss:$16 sps:$4 sm:$0xff]  }
 0x160   :  { %2637 = vmatpush1.bf16.msra.mxu0 %v4003_v45  ;;  %2719 = vmatpush1.bf16.msra.mxu1 %v4006_v46  ;;  %v345_v45 = vlaneseq }
 0x161   :  { %2638 = vmatprep.subr.bf16.mxu0 %v4011_v47  ;;  %2720 = vmatprep.subr.bf16.mxu1 %v4014_v48  ;;  %v4565_v48 = vld [vmem:[#allocation7] sm:$0xf] }
 0x162   :  { %v4562_v46 = vshrl.u32 %v345_v45, 7  ;;  %v4161_v45 = vld [vmem:[#allocation8 + $0x344] ss:$16 sps:$4 sm:$0xff]  }
 0x164   :  { %2639 = vmatpush1.bf16.msra.mxu0 %v4009_v49  ;;  %2721 = vmatpush1.bf16.msra.mxu1 %v4012_v50  ;;  %v347_v47 = vsub.s32 0, %v4562_v46  ;;  %v351_v49 = vsub.s32 1, %v4562_v46  ;;  %v359_v50 = vsub.s32 3, %v4562_v46 }
 0x165   :  { %2640 = vmatprep.subr.bf16.mxu0 %v4017_v51  ;;  %2722 = vmatprep.subr.bf16.mxu1 %v4020_v52 }
 0x166   :  { %v348_v51 = vrot.slane %v4565_v48, %v347_v47  ;;  %v352_v52 = vrot.slane %v4565_v48, %v351_v49 }
 0x168   :  { %2641 = vmatpush1.bf16.msra.mxu0 %v4015_v53  ;;  %2723 = vmatpush1.bf16.msra.mxu1 %v4018_v54  ;;  %v360_v53 = vrot.slane %v4565_v48, %v359_v50 }
 0x169   :  { %2642 = vmatprep.subr.bf16.mxu0 %v4023_v55  ;;  %2724 = vmatprep.subr.bf16.mxu1 %v4026_v56 }
 0x16c   :  { %2643 = vmatpush1.bf16.msra.mxu0 %v4021_v57  ;;  %2725 = vmatpush1.bf16.msra.mxu1 %v4024_v58 }
 0x16d   :  { %2644 = vmatprep.subr.bf16.mxu0 %v4029_v59  ;;  %2726 = vmatprep.subr.bf16.mxu1 %v4032_v60 }
 0x170   :  { %2645 = vmatpush1.bf16.msra.mxu0 %v4027_v61  ;;  %2727 = vmatpush1.bf16.msra.mxu1 %v4030_v62 }
 0x171   :  { %2646 = vmatprep.subr.bf16.mxu0 %v4035_v63  ;;  %2728 = vmatprep.subr.bf16.mxu1 %v4038_v0 }
 0x174   :  { %2647 = vmatpush1.bf16.msra.mxu0 %v4033_v1  ;;  %2729 = vmatpush1.bf16.msra.mxu1 %v4036_v2 }
 0x175   :  { %2648 = vmatprep.subr.bf16.mxu0 %v4041_v3  ;;  %2730 = vmatprep.subr.bf16.mxu1 %v4044_v4 }
 0x178   :  { %2649 = vmatpush1.bf16.msra.mxu0 %v4039_v5  ;;  %2731 = vmatpush1.bf16.msra.mxu1 %v4042_v6  ;;  %v4099_v5 = vld [vmem:[#allocation8 + $0x200] ss:$16 sps:$4 sm:$0xff]   ;;  %v4102_v6 = vld [vmem:[#allocation8 + $0x208] ss:$16 sps:$4 sm:$0xff]  }
 0x179   :  { %2650 = vmatprep.subr.bf16.mxu0 %v4047_v7  ;;  %2732 = vmatprep.subr.bf16.mxu1 %v4050_v8  ;;  %v4107_v8 = vld [vmem:[#allocation8 + $0x224] ss:$16 sps:$4 sm:$0xff]  }
 0x17c   :  { %2651 = vmatpush1.bf16.msra.mxu0 %v4045_v9  ;;  %2733 = vmatpush1.bf16.msra.mxu1 %v4048_v10  ;;  %v4110_v9 = vld [vmem:[#allocation8 + $0x22c] ss:$16 sps:$4 sm:$0xff]  }
 0x17d   :  { %2652 = vmatprep.subr.bf16.mxu0 %v4053_v12  ;;  %2734 = vmatprep.subr.bf16.mxu1 %v4056_v13  ;;  %v4105_v12 = vld [vmem:[#allocation8 + $0x220] ss:$16 sps:$4 sm:$0xff]   ;;  %v4108_v13 = vld [vmem:[#allocation8 + $0x228] ss:$16 sps:$4 sm:$0xff]  }
 0x180   :  { %2653 = vmatpush1.bf16.msra.mxu0 %v4051_v14  ;;  %2735 = vmatpush1.bf16.msra.mxu1 %v4054_v15  ;;  %v4113_v14 = vld [vmem:[#allocation8 + $0x244] ss:$16 sps:$4 sm:$0xff]   ;;  %v4116_v15 = vld [vmem:[#allocation8 + $0x24c] ss:$16 sps:$4 sm:$0xff]  }
 0x181   :  { %2654 = vmatprep.subr.bf16.mxu0 %v4059_v16  ;;  %2736 = vmatprep.subr.bf16.mxu1 %v4062_v17  ;;  %v4111_v16 = vld [vmem:[#allocation8 + $0x240] ss:$16 sps:$4 sm:$0xff]   ;;  %v4114_v17 = vld [vmem:[#allocation8 + $0x248] ss:$16 sps:$4 sm:$0xff]  }
 0x184   :  { %2655 = vmatpush1.bf16.msra.mxu0 %v4057_v18  ;;  %2737 = vmatpush1.bf16.msra.mxu1 %v4060_v19  ;;  %v4119_v18 = vld [vmem:[#allocation8 + $0x264] ss:$16 sps:$4 sm:$0xff]   ;;  %v4122_v19 = vld [vmem:[#allocation8 + $0x26c] ss:$16 sps:$4 sm:$0xff]  }
 0x185   :  { %2656 = vmatprep.subr.bf16.mxu0 %v4065_v20  ;;  %2738 = vmatprep.subr.bf16.mxu1 %v4068_v21  ;;  %v4117_v20 = vld [vmem:[#allocation8 + $0x260] ss:$16 sps:$4 sm:$0xff]   ;;  %v4120_v21 = vld [vmem:[#allocation8 + $0x268] ss:$16 sps:$4 sm:$0xff]  }
 0x188   :  { %2657 = vmatpush1.bf16.msra.mxu0 %v4063_v22  ;;  %2739 = vmatpush1.bf16.msra.mxu1 %v4066_v11  ;;  %v4125_v22 = vld [vmem:[#allocation8 + $0x284] ss:$16 sps:$4 sm:$0xff]   ;;  %v4128_v11 = vld [vmem:[#allocation8 + $0x28c] ss:$16 sps:$4 sm:$0xff]  }
 0x189   :  { %2658 = vmatprep.subr.bf16.mxu0 %v4071_v23  ;;  %2740 = vmatprep.subr.bf16.mxu1 %v4074_v24  ;;  %v4123_v23 = vld [vmem:[#allocation8 + $0x280] ss:$16 sps:$4 sm:$0xff]   ;;  %v4126_v24 = vld [vmem:[#allocation8 + $0x288] ss:$16 sps:$4 sm:$0xff]  }
 0x18c   :  { %2659 = vmatpush1.bf16.msra.mxu0 %v4069_v25  ;;  %2741 = vmatpush1.bf16.msra.mxu1 %v4072_v26  ;;  %v4131_v25 = vld [vmem:[#allocation8 + $0x2a4] ss:$16 sps:$4 sm:$0xff]   ;;  %v4134_v26 = vld [vmem:[#allocation8 + $0x2ac] ss:$16 sps:$4 sm:$0xff]  }
 0x18d   :  { %2660 = vmatprep.subr.bf16.mxu0 %v4077_v27  ;;  %2742 = vmatprep.subr.bf16.mxu1 %v4080_v28  ;;  %v4129_v27 = vld [vmem:[#allocation8 + $0x2a0] ss:$16 sps:$4 sm:$0xff]   ;;  %v4132_v28 = vld [vmem:[#allocation8 + $0x2a8] ss:$16 sps:$4 sm:$0xff]  }
 0x190   :  { %2661 = vmatpush1.bf16.msra.mxu0 %v4075_v29  ;;  %2743 = vmatpush1.bf16.msra.mxu1 %v4078_v30  ;;  %v4137_v29 = vld [vmem:[#allocation8 + $0x2c4] ss:$16 sps:$4 sm:$0xff]   ;;  %v4140_v30 = vld [vmem:[#allocation8 + $0x2cc] ss:$16 sps:$4 sm:$0xff]  }
 0x191   :  { %2662 = vmatprep.subr.bf16.mxu0 %v4083_v31  ;;  %2744 = vmatprep.subr.bf16.mxu1 %v4086_v32  ;;  %v4135_v31 = vld [vmem:[#allocation8 + $0x2c0] ss:$16 sps:$4 sm:$0xff]   ;;  %v4138_v32 = vld [vmem:[#allocation8 + $0x2c8] ss:$16 sps:$4 sm:$0xff]  }
 0x194   :  { %2663 = vmatpush1.bf16.msra.mxu0 %v4081_v33  ;;  %2745 = vmatpush1.bf16.msra.mxu1 %v4084_v34  ;;  %v4143_v33 = vld [vmem:[#allocation8 + $0x2e4] ss:$16 sps:$4 sm:$0xff]   ;;  %v4146_v34 = vld [vmem:[#allocation8 + $0x2ec] ss:$16 sps:$4 sm:$0xff]  }
 0x195   :  { %2664 = vmatprep.subr.bf16.mxu0 %v4089_v35  ;;  %2746 = vmatprep.subr.bf16.mxu1 %v4092_v36  ;;  %v4141_v35 = vld [vmem:[#allocation8 + $0x2e0] ss:$16 sps:$4 sm:$0xff]   ;;  %v4144_v36 = vld [vmem:[#allocation8 + $0x2e8] ss:$16 sps:$4 sm:$0xff]  }
 0x198   :  { %2665 = vmatpush1.bf16.msra.mxu0 %v4087_v37  ;;  %2747 = vmatpush1.bf16.msra.mxu1 %v4090_v38  ;;  %v4149_v37 = vld [vmem:[#allocation8 + $0x304] ss:$16 sps:$4 sm:$0xff]   ;;  %v4152_v38 = vld [vmem:[#allocation8 + $0x30c] ss:$16 sps:$4 sm:$0xff]  }
 0x199   :  { %2666 = vmatprep.subr.bf16.mxu0 %v4095_v39  ;;  %2748 = vmatprep.subr.bf16.mxu1 %v4098_v40  ;;  %v4147_v39 = vld [vmem:[#allocation8 + $0x300] ss:$16 sps:$4 sm:$0xff]   ;;  %v4150_v40 = vld [vmem:[#allocation8 + $0x308] ss:$16 sps:$4 sm:$0xff]  }
 0x19c   :  { %2667 = vmatpush1.bf16.msra.mxu0 %v4093_v41  ;;  %2749 = vmatpush1.bf16.msra.mxu1 %v4096_v42  ;;  %v4155_v41 = vld [vmem:[#allocation8 + $0x324] ss:$16 sps:$4 sm:$0xff]   ;;  %v4158_v42 = vld [vmem:[#allocation8 + $0x32c] ss:$16 sps:$4 sm:$0xff]  }
 0x19d   :  { %2677 = vmatprep.subr.bf16.mxu0 %v4101_v43  ;;  %2759 = vmatprep.subr.bf16.mxu1 %v4104_v44  ;;  %v4153_v43 = vld [vmem:[#allocation8 + $0x320] ss:$16 sps:$4 sm:$0xff]   ;;  %v4156_v44 = vld [vmem:[#allocation8 + $0x328] ss:$16 sps:$4 sm:$0xff]  }
 0x232   :  { %v1667_v54 = vpop.f32.mrb[0].mxu0  ;;  %v4578_v55 = vpop.f32.mrb[0].mxu1 }
 0x233   :  { %v3607_v56 = vadd.f32 %v1667_v54, %v348_v51  ;;  %v1669_v57 = vpop.f32.mrb[1].mxu0  ;;  %v1833_v58 = vpop.f32.mrb[1].mxu1  ;;  %v4164_v51 = vld [vmem:[#allocation8 + $0x34c] ss:$16 sps:$4 sm:$0xff]   ;;  %v4167_v54 = vld [vmem:[#allocation8 + $0x364] ss:$16 sps:$4 sm:$0xff]  }
 0x234   :  { %v3608_v59 = vadd.f32 %v1669_v57, %v352_v52  ;;  %v3610_v60 = vadd.f32 %v1833_v58, %v360_v53  ;;  %v1671_v61 = vpop.f32.mrb[2].mxu0  ;;  %v1835_v62 = vpop.f32.mrb[2].mxu1  ;;  %v4159_v52 = vld [vmem:[#allocation8 + $0x340] ss:$16 sps:$4 sm:$0xff]   ;;  %v4162_v53 = vld [vmem:[#allocation8 + $0x348] ss:$16 sps:$4 sm:$0xff]  }
 0x235   :  { %v1838_v63 = vmax.f32 %v3607_v56, 0.0  ;;  %v1672_v0 = vpop.f32.mrb[3].mxu0  ;;  %v1836_v1 = vpop.f32.mrb[3].mxu1  ;;  %v4170_v56 = vld [vmem:[#allocation8 + $0x36c] ss:$16 sps:$4 sm:$0xff]  }
 0x236   :  { %v1839_v2 = vmax.f32 %v3608_v59, 0.0  ;;  %v1841_v3 = vmax.f32 %v3610_v60, 0.0  ;;  %v4165_v57 = vld [vmem:[#allocation8 + $0x360] ss:$16 sps:$4 sm:$0xff]   ;;  %v4168_v58 = vld [vmem:[#allocation8 + $0x368] ss:$16 sps:$4 sm:$0xff]  }
 0x237   :  { %v1842_v7 = vpack.c.bf16 %v1838_v63, %v1838_v63  ;;  %v4173_v59 = vld [vmem:[#allocation8 + $0x384] ss:$16 sps:$4 sm:$0xff]   ;;  %v4176_v60 = vld [vmem:[#allocation8 + $0x38c] ss:$16 sps:$4 sm:$0xff]   ;;  %v4171_v61 = vld [vmem:[#allocation8 + $0x380] ss:$16 sps:$4 sm:$0xff]  }
 0x238   :  { %v1843_v4 = vpack.c.bf16 %v1839_v2, %v1839_v2  ;;  %v1845_v10 = vpack.c.bf16 %v1841_v3, %v1841_v3  ;;  %v4174_v62 = vld [vmem:[#allocation8 + $0x388] ss:$16 sps:$4 sm:$0xff]   ;;  %v355_v63 = vsub.s32 2, %v4562_v46  ;;  %v4179_v0 = vld [vmem:[#allocation8 + $0x3a4] ss:$16 sps:$4 sm:$0xff]  }
 0x239   :  { %v4182_v1 = vld [vmem:[#allocation8 + $0x3ac] ss:$16 sps:$4 sm:$0xff]   ;;  %v4177_v2 = vld [vmem:[#allocation8 + $0x3a0] ss:$16 sps:$4 sm:$0xff]   ;;  %v4180_v3 = vld [vmem:[#allocation8 + $0x3a8] ss:$16 sps:$4 sm:$0xff]  }
 0x23a   :  { %2668 = vmatprep.mubr.bf16.mxu0 %v1843_v4  ;;  %2750 = vmatprep.mubr.bf16.mxu1 %v1843_v4  ;;  %v356_v4 = vrot.slane %v4565_v48, %v355_v63  ;;  %v4195_v48 = vld [vmem:[#allocation11 + $0x40] sm:$0xff]  }
 0x23b   :  { %2669 = vmatmul.mubr.bf16.vlgmr.msra.gmra.mrb[4].mxu0 %v1842_v7  ;;  %2751 = vmatmul.mubr.bf16.vlgmr.msra.gmra.mrb[4].mxu1 %v1842_v7  ;;  %v4183_v7 = vld [vmem:[#allocation8 + $0x3c0] ss:$16 sps:$4 sm:$0xff]  }
 0x23c   :  { %2678 = vmatpush1.bf16.msra.mxu0 %v4099_v5  ;;  %2760 = vmatpush1.bf16.msra.mxu1 %v4102_v6  ;;  %v4185_v5 = vld [vmem:[#allocation8 + $0x3c4] ss:$16 sps:$4 sm:$0xff]   ;;  %v4188_v6 = vld [vmem:[#allocation8 + $0x3cc] ss:$16 sps:$4 sm:$0xff]  }
 0x23d   :  { %2709 = vmatprep.mubr.bf16.mxu0 %v1845_v10  ;;  %2791 = vmatprep.mubr.bf16.mxu1 %v1845_v10  ;;  %v4191_v10 = vld [vmem:[#allocation8 + $0x3e4] ss:$16 sps:$4 sm:$0xff]  }
 0x23e   :  { %2679 = vmatprep.subr.bf16.mxu0 %v4107_v8  ;;  %2761 = vmatprep.subr.bf16.mxu1 %v4110_v9  ;;  %v4186_v8 = vld [vmem:[#allocation8 + $0x3c8] ss:$16 sps:$4 sm:$0xff]   ;;  %v3609_v9 = vadd.f32 %v4578_v55, %v356_v4  ;;  %v4199_v55 = vld [vmem:[#allocation11 + $0x48] sm:$0xff]  }
 0x240   :  { %2680 = vmatpush1.bf16.msra.mxu0 %v4105_v12  ;;  %2762 = vmatpush1.bf16.msra.mxu1 %v4108_v13  ;;  %v4194_v12 = vld [vmem:[#allocation8 + $0x3ec] ss:$16 sps:$4 sm:$0xff]   ;;  %v4189_v13 = vld [vmem:[#allocation8 + $0x3e0] ss:$16 sps:$4 sm:$0xff]  }
 0x241   :  { %2681 = vmatprep.subr.bf16.mxu0 %v4113_v14  ;;  %2763 = vmatprep.subr.bf16.mxu1 %v4116_v15  ;;  %v4192_v14 = vld [vmem:[#allocation8 + $0x3e8] ss:$16 sps:$4 sm:$0xff]   ;;  %v1840_v15 = vmax.f32 %v3609_v9, 0.0 }
 0x244   :  { %2682 = vmatpush1.bf16.msra.mxu0 %v4111_v16  ;;  %2764 = vmatpush1.bf16.msra.mxu1 %v4114_v17  ;;  %v4196_v16 = vld [vmem:[#allocation11 + $0xc0] sm:$0xff]  }
 0x245   :  { %2683 = vmatprep.subr.bf16.mxu0 %v4119_v18  ;;  %2765 = vmatprep.subr.bf16.mxu1 %v4122_v19  ;;  %v4197_v17 = vld [vmem:[#allocation11] sm:$0xff]   ;;  %v1844_v19 = vpack.c.bf16 %v1840_v15, %v1840_v15 }
 0x246   :  { %v4198_v18 = vld [vmem:[#allocation11 + $0x80] sm:$0xff]  }
 0x248   :  { %2684 = vmatpush1.bf16.msra.mxu0 %v4117_v20  ;;  %2766 = vmatpush1.bf16.msra.mxu1 %v4120_v21  ;;  %v4200_v20 = vld [vmem:[#allocation11 + $0xc8] sm:$0xff]  }
 0x249   :  { %2685 = vmatprep.subr.bf16.mxu0 %v4125_v22  ;;  %2767 = vmatprep.subr.bf16.mxu1 %v4128_v11  ;;  %v4201_v21 = vld [vmem:[#allocation11 + $0x8] sm:$0xff]   ;;  %v4203_v11 = vld [vmem:[#allocation11 + $0x50] sm:$0xff]  }
 0x24a   :  { %v4202_v22 = vld [vmem:[#allocation11 + $0x88] sm:$0xff]  }
 0x24c   :  { %2686 = vmatpush1.bf16.msra.mxu0 %v4123_v23  ;;  %2768 = vmatpush1.bf16.msra.mxu1 %v4126_v24  ;;  %v4204_v23 = vld [vmem:[#allocation11 + $0xd0] sm:$0xff]  }
 0x24d   :  { %2687 = vmatprep.subr.bf16.mxu0 %v4131_v25  ;;  %2769 = vmatprep.subr.bf16.mxu1 %v4134_v26  ;;  %v4205_v24 = vld [vmem:[#allocation11 + $0x10] sm:$0xff]   ;;  %v4207_v26 = vld [vmem:[#allocation11 + $0x58] sm:$0xff]  }
 0x24e   :  { %v4206_v25 = vld [vmem:[#allocation11 + $0x90] sm:$0xff]  }
 0x250   :  { %2688 = vmatpush1.bf16.msra.mxu0 %v4129_v27  ;;  %2770 = vmatpush1.bf16.msra.mxu1 %v4132_v28  ;;  %v4208_v27 = vld [vmem:[#allocation11 + $0xd8] sm:$0xff]  }
 0x251   :  { %2689 = vmatprep.subr.bf16.mxu0 %v4137_v29  ;;  %2771 = vmatprep.subr.bf16.mxu1 %v4140_v30  ;;  %v4209_v28 = vld [vmem:[#allocation11 + $0x18] sm:$0xff]   ;;  %v4211_v30 = vld [vmem:[#allocation11 + $0x60] sm:$0xff]  }
 0x252   :  { %v4210_v29 = vld [vmem:[#allocation11 + $0x98] sm:$0xff]  }
 0x254   :  { %2690 = vmatpush1.bf16.msra.mxu0 %v4135_v31  ;;  %2772 = vmatpush1.bf16.msra.mxu1 %v4138_v32  ;;  %v4212_v31 = vld [vmem:[#allocation11 + $0xe0] sm:$0xff]  }
 0x255   :  { %2691 = vmatprep.subr.bf16.mxu0 %v4143_v33  ;;  %2773 = vmatprep.subr.bf16.mxu1 %v4146_v34  ;;  %v4213_v32 = vld [vmem:[#allocation11 + $0x20] sm:$0xff]   ;;  %v4215_v34 = vld [vmem:[#allocation11 + $0x68] sm:$0xff]  }
 0x256   :  { %v4214_v33 = vld [vmem:[#allocation11 + $0xa0] sm:$0xff]  }
 0x258   :  { %2692 = vmatpush1.bf16.msra.mxu0 %v4141_v35  ;;  %2774 = vmatpush1.bf16.msra.mxu1 %v4144_v36  ;;  %v4216_v35 = vld [vmem:[#allocation11 + $0xe8] sm:$0xff]  }
 0x259   :  { %2693 = vmatprep.subr.bf16.mxu0 %v4149_v37  ;;  %2775 = vmatprep.subr.bf16.mxu1 %v4152_v38  ;;  %v4217_v36 = vld [vmem:[#allocation11 + $0x28] sm:$0xff]   ;;  %v4219_v38 = vld [vmem:[#allocation11 + $0x70] sm:$0xff]  }
 0x25a   :  { %v4218_v37 = vld [vmem:[#allocation11 + $0xa8] sm:$0xff]  }
 0x25c   :  { %2694 = vmatpush1.bf16.msra.mxu0 %v4147_v39  ;;  %2776 = vmatpush1.bf16.msra.mxu1 %v4150_v40  ;;  %v4220_v39 = vld [vmem:[#allocation11 + $0xf0] sm:$0xff]  }
 0x25d   :  { %2695 = vmatprep.subr.bf16.mxu0 %v4155_v41  ;;  %2777 = vmatprep.subr.bf16.mxu1 %v4158_v42  ;;  %v4221_v40 = vld [vmem:[#allocation11 + $0x30] sm:$0xff]   ;;  %v4223_v42 = vld [vmem:[#allocation11 + $0x78] sm:$0xff]  }
 0x25e   :  { %v4222_v41 = vld [vmem:[#allocation11 + $0xb0] sm:$0xff]  }
 0x260   :  { %2696 = vmatpush1.bf16.msra.mxu0 %v4153_v43  ;;  %2778 = vmatpush1.bf16.msra.mxu1 %v4156_v44  ;;  %v4224_v43 = vld [vmem:[#allocation11 + $0xf8] sm:$0xff]  }
 0x261   :  { %2697 = vmatprep.subr.bf16.mxu0 %v4161_v45  ;;  %2779 = vmatprep.subr.bf16.mxu1 %v4164_v51  ;;  %v4225_v44 = vld [vmem:[#allocation11 + $0x38] sm:$0xff]  }
 0x262   :  { %v4226_v45 = vld [vmem:[#allocation11 + $0xb8] sm:$0xff]  }
 0x263   :  { %v1974_v51 = vld [vmem:[#allocation10] sm:$0xf] }
 0x264   :  { %2698 = vmatpush1.bf16.msra.mxu0 %v4159_v52  ;;  %2780 = vmatpush1.bf16.msra.mxu1 %v4162_v53  ;;  %v1979_v52 = vrot.slane %v1974_v51, %v347_v47  ;;  %v1987_v53 = vrot.slane %v1974_v51, %v355_v63 }
 0x265   :  { %2699 = vmatprep.subr.bf16.mxu0 %v4167_v54  ;;  %2781 = vmatprep.subr.bf16.mxu1 %v4170_v56  ;;  %v1983_v54 = vrot.slane %v1974_v51, %v351_v49  ;;  %v1991_v56 = vrot.slane %v1974_v51, %v359_v50 }
 0x268   :  { %2700 = vmatpush1.bf16.msra.mxu0 %v4165_v57  ;;  %2782 = vmatpush1.bf16.msra.mxu1 %v4168_v58 }
 0x269   :  { %2701 = vmatprep.subr.bf16.mxu0 %v4173_v59  ;;  %2783 = vmatprep.subr.bf16.mxu1 %v4176_v60 }
 0x26c   :  { %2702 = vmatpush1.bf16.msra.mxu0 %v4171_v61  ;;  %2784 = vmatpush1.bf16.msra.mxu1 %v4174_v62 }
 0x26d   :  { %2703 = vmatprep.subr.bf16.mxu0 %v4179_v0  ;;  %2785 = vmatprep.subr.bf16.mxu1 %v4182_v1 }
 0x270   :  { %2704 = vmatpush1.bf16.msra.mxu0 %v4177_v2  ;;  %2786 = vmatpush1.bf16.msra.mxu1 %v4180_v3 }
 0x271   :  { %2705 = vmatprep.subr.bf16.mxu0 %v4185_v5  ;;  %2787 = vmatprep.subr.bf16.mxu1 %v4188_v6 }
 0x274   :  { %2706 = vmatpush1.bf16.msra.mxu0 %v4183_v7  ;;  %2788 = vmatpush1.bf16.msra.mxu1 %v4186_v8 }
 0x275   :  { %2707 = vmatprep.subr.bf16.mxu0 %v4191_v10  ;;  %2789 = vmatprep.subr.bf16.mxu1 %v4194_v12  ;;  %v3530_v12 = vld [vmem:[#allocation13] ss:$0 sm:$0xff] }
 0x278   :  { %2708 = vmatpush1.bf16.msra.mxu0 %v4189_v13  ;;  %2790 = vmatpush1.bf16.msra.mxu1 %v4192_v14 }
 0x279   :  { %3563 = vmatprep.subr.bf16.mxu0 %v4195_v48  ;;  %3585 = vmatprep.subr.bf16.mxu1 %v4196_v16 }
 0x27b   :  { %2710 = vmatmul.mubr.bf16.vlgmr.msra.gmra.mrb[4].mxu0 %v1844_v19  ;;  %2792 = vmatmul.mubr.bf16.vlgmr.msra.gmra.mrb[4].mxu1 %v1844_v19 }
 0x27c   :  { %3564 = vmatpush3.bf16.msra.mxu0 %v4197_v17  ;;  %3586 = vmatpush3.bf16.msra.mxu1 %v4198_v18 }
 0x27d   :  { %3565 = vmatprep.subr.bf16.mxu0 %v4199_v55  ;;  %3587 = vmatprep.subr.bf16.mxu1 %v4200_v20 }
 0x280   :  { %3566 = vmatpush3.bf16.msra.mxu0 %v4201_v21  ;;  %3588 = vmatpush3.bf16.msra.mxu1 %v4202_v22 }
 0x281   :  { %3567 = vmatprep.subr.bf16.mxu0 %v4203_v11  ;;  %3589 = vmatprep.subr.bf16.mxu1 %v4204_v23 }
 0x284   :  { %3568 = vmatpush3.bf16.msra.mxu0 %v4205_v24  ;;  %3590 = vmatpush3.bf16.msra.mxu1 %v4206_v25 }
 0x285   :  { %3569 = vmatprep.subr.bf16.mxu0 %v4207_v26  ;;  %3591 = vmatprep.subr.bf16.mxu1 %v4208_v27 }
 0x288   :  { %3570 = vmatpush3.bf16.msra.mxu0 %v4209_v28  ;;  %3592 = vmatpush3.bf16.msra.mxu1 %v4210_v29 }
 0x289   :  { %3571 = vmatprep.subr.bf16.mxu0 %v4211_v30  ;;  %3593 = vmatprep.subr.bf16.mxu1 %v4212_v31 }
 0x28c   :  { %3572 = vmatpush3.bf16.msra.mxu0 %v4213_v32  ;;  %3594 = vmatpush3.bf16.msra.mxu1 %v4214_v33 }
 0x28d   :  { %3573 = vmatprep.subr.bf16.mxu0 %v4215_v34  ;;  %3595 = vmatprep.subr.bf16.mxu1 %v4216_v35 }
 0x290   :  { %3574 = vmatpush3.bf16.msra.mxu0 %v4217_v36  ;;  %3596 = vmatpush3.bf16.msra.mxu1 %v4218_v37 }
 0x291   :  { %3575 = vmatprep.subr.bf16.mxu0 %v4219_v38  ;;  %3597 = vmatprep.subr.bf16.mxu1 %v4220_v39 }
 0x294   :  { %3576 = vmatpush3.bf16.msra.mxu0 %v4221_v40  ;;  %3598 = vmatpush3.bf16.msra.mxu1 %v4222_v41 }
 0x295   :  { %3577 = vmatprep.subr.bf16.mxu0 %v4223_v42  ;;  %3599 = vmatprep.subr.bf16.mxu1 %v4224_v43 }
 0x298   :  { %3578 = vmatpush3.bf16.msra.mxu0 %v4225_v44  ;;  %3600 = vmatpush3.bf16.msra.mxu1 %v4226_v45 }
 0x34e   :  { %v2711_v57 = vpop.f32.mrb[4].mxu0  ;;  %v2793_v58 = vpop.f32.mrb[4].mxu1 }
 0x34f   :  { %v3611_v59 = vadd.f32 %v2711_v57, %v1979_v52  ;;  %v3613_v60 = vadd.f32 %v2793_v58, %v1987_v53  ;;  %v2713_v61 = vpop.f32.mrb[5].mxu0  ;;  %v2795_v62 = vpop.f32.mrb[5].mxu1 }
 0x350   :  { %v3612_v0 = vadd.f32 %v2713_v61, %v1983_v54  ;;  %v3614_v1 = vadd.f32 %v2795_v62, %v1991_v56  ;;  %v2715_v2 = vpop.f32.mrb[6].mxu0  ;;  %v2797_v3 = vpop.f32.mrb[6].mxu1 }
 0x351   :  { %v2800_v47 = vmax.f32 %v3611_v59, 0.0  ;;  %v2802_v4 = vmax.f32 %v3613_v60, 0.0  ;;  %v2716_v5 = vpop.f32.mrb[7].mxu0  ;;  %v2798_v63 = vpop.f32.mrb[7].mxu1 }
 0x352   :  { %v2801_v6 = vmax.f32 %v3612_v0, 0.0  ;;  %v2803_v7 = vmax.f32 %v3614_v1, 0.0 }
 0x353   :  { %v2804_v46 = vpack.c.bf16 %v2800_v47, %v2800_v47  ;;  %v2806_v50 = vpack.c.bf16 %v2802_v4, %v2802_v4 }
 0x354   :  { %v2805_v49 = vpack.c.bf16 %v2801_v6, %v2801_v6  ;;  %v2807_v8 = vpack.c.bf16 %v2803_v7, %v2803_v7 }
 0x356   :  { %3103 = vmatprep.mubr.bf16.mxu0 %v2805_v49  ;;  %3143 = vmatprep.mubr.bf16.mxu1 %v2807_v8 }
 0x357   :  { %3104 = vmatmul.mubr.bf16.vlgmr.msra.gmra.mrb[8].mxu0 %v2804_v46  ;;  %3144 = vmatmul.mubr.bf16.vlgmr.msra.gmra.mrb[8].mxu1 %v2806_v50 }
 0x42a   :  { %v3579_v9 = vpop.f32.mrb[8].mxu0  ;;  %v3601_v10 = vpop.f32.mrb[8].mxu1 }
 0x42b   :  { %v3580_v13 = vpop.f32.mrb[9].mxu0  ;;  %v3602_v14 = vpop.f32.mrb[9].mxu1 }
 0x42c   :  { %v3581_v15 = vadd.f32 %v3580_v13, %v3579_v9  ;;  %v3603_v48 = vadd.f32 %v3602_v14, %v3601_v10  ;;  %v3582_v16 = vpop.f32.mrb[10].mxu0  ;;  %v3604_v17 = vpop.f32.mrb[10].mxu1 }
 0x42d   :  { %v3583_v18 = vpop.f32.mrb[11].mxu0  ;;  %v3605_v19 = vpop.f32.mrb[11].mxu1 }
 0x42e   :  { %v3106_v55 = vadd.f32 %v3581_v15, %v3530_v12 }
 0x430   :  { %v3146_v20 = vadd.f32 %v3603_v48, %v3106_v55 }
 0x432   :  { %v3151_v21 = vmax.f32 %v3146_v20, 0.0 }
 0x434   :  { %3152 = vst [vmem:[#allocation14] sm:$0xff] %v3151_v21 }
 0x435   :  { %4392 = shalt.err (!%p4389_p4)
}
 0x436   :  { %s4393_s11 = scalar_lea.hbm %s4612_s7, 128 }
 0x437   :  { %p4394_p5 = scmp.ne.s32.totalorder %s4612_s7, %s4393_s11  ;;  %p4397_p6 = scmp.lt.u32.totalorder %s4393_s11, %s4612_s7 }
 0x439   :  { %p4399_p7 = pnand %p4397_p6, %p4394_p5 }
 0x43b   :  { %4402 = shalt.err (!%p4399_p7)
}
 0x43c   :  { %3162 = dma.vmem_to_hbm [thread:$0]  %s3160_s13, 128, %s4612_s7, [#allocation4]  }
 0x43d   :  { %4411 = dma.done.wait [#allocation4], 128  }
 0x43e   :  { %4412 = vsyncadd [#allocation4], 4294967168 }
 0x43f   :  { %3166 = vsyncpa [#allocation3], 1 }
 0x440   :  { %3167 = vsyncpa [#allocation6], 1 }
 0x441   :  { %3168 = vsyncpa [#allocation9], 1 }
 0x442   :  { %3169 = vsyncpa [#allocation12], 1 }
 0x443   :  { %3170 = vsyncpa [#allocation4], 1 }

</bundles_post_ra>
